<compile_context>
chip_gen: v7x
topology: tpu7x:2x2x1
jax: 0.10.0
libtpu: 0.0.40
codegen_flags: <defaults>
</compile_context>

<pallas_src>
import functools

import jax
import jax.numpy as jnp
from jax.experimental import pallas as pl
from jax.experimental.pallas import tpu as pltpu

# ----------------------------- tiny Llama config -----------------------------
VOCAB = 256
HIDDEN = 64
N_HEADS = 4
N_KV_HEADS = 2
HEAD_DIM = HIDDEN // N_HEADS            # 16
HALF = HEAD_DIM // 2                    # 8
Q_SIZE = N_HEADS * HEAD_DIM             # 64
KV_SIZE = N_KV_HEADS * HEAD_DIM         # 32
QKV_OUT = Q_SIZE + 2 * KV_SIZE          # 128
QKV_EXT = QKV_OUT + Q_SIZE + KV_SIZE    # 224 (adds rotate_half(q), rotate_half(k))
INTER = 128
N_LAYERS = 2
EPS = 1e-6
ROPE_THETA = 10000.0
SCALE = HEAD_DIM ** -0.5
G = N_HEADS // N_KV_HEADS               # GQA group size (2)
NEG_INF = -1e30

_vmem = functools.partial(pl.BlockSpec, memory_space=pltpu.MemorySpace.VMEM)


# ------------------------- in-kernel helper functions -------------------------
def _rmsnorm(x, w):
    # f32 RMSNorm (variance + rsqrt kept in f32 on all generations).
    var = jnp.mean(x * x, axis=-1, keepdims=True)
    return x * jax.lax.rsqrt(var + EPS) * w


# ------------------------------ fused forward kernel --------------------------
def _llama_fwd_kernel(ids_ref, cos_q_ref, sin_q_ref, cos_k_ref, sin_k_ref,
                      embed_ref, lm_head_ref, final_norm_ref, *rest):
    out_ref = rest[-1]
    layer_refs = rest[:-1]
    assert len(layer_refs) == 6 * N_LAYERS

    T = ids_ref.shape[0]

    # --- embed_tokens as a bf16 one-hot matmul (0/1 exact in bf16) ------------
    ids = ids_ref[...]                                           # (T, 1) int32
    vcol = jax.lax.broadcasted_iota(jnp.int32, (T, VOCAB), 1)
    one_hot = (vcol == ids).astype(jnp.bfloat16)
    h = jnp.dot(one_hot, embed_ref[...],
                preferred_element_type=jnp.float32)              # (T, HIDDEN)

    cos_q = cos_q_ref[...]                                       # (T, Q_SIZE)
    sin_q = sin_q_ref[...]
    cos_k = cos_k_ref[...]                                       # (T, KV_SIZE)
    sin_k = sin_k_ref[...]

    # causal mask for the (G*T, T) group-stacked scores; row r -> token r % T.
    # TODO(synk): mask assumes contiguous prefill (positions 0..T-1); no paged
    # KV cache / offset decode as in RadixAttention's ForwardBatch path.
    rowi = jax.lax.broadcasted_iota(jnp.int32, (G * T, T), 0)
    coli = jax.lax.broadcasted_iota(jnp.int32, (G * T, T), 1)
    causal = coli <= (rowi % T)

    residual = None
    for li in range(N_LAYERS):
        (w_in_ref, w_post_ref, wqkv_ref, wo_ref,
         wgu_ref, wdown_ref) = layer_refs[li * 6:(li + 1) * 6]

        # ---- input_layernorm (+ residual add after the first layer) ---------
        if residual is None:
            residual = h
        else:
            residual = h + residual
        x = _rmsnorm(residual, w_in_ref[...])

        # ---- qkv_proj, extended with rotate_half(q)/rotate_half(k) columns ---
        # (SCALE is pre-folded into the q columns on the host.)
        qkv = jnp.dot(x.astype(jnp.bfloat16), wqkv_ref[...],
                      preferred_element_type=jnp.float32)        # (T, 224)
        q = qkv[:, :Q_SIZE]
        k = qkv[:, Q_SIZE:Q_SIZE + KV_SIZE]
        v = qkv[:, Q_SIZE + KV_SIZE:QKV_OUT]
        q_rh = qkv[:, QKV_OUT:QKV_OUT + Q_SIZE]                  # rotate_half(q)
        k_rh = qkv[:, QKV_OUT + Q_SIZE:]                         # rotate_half(k)

        # ---- RoPE: pure wide elementwise math, applied once per packed tensor
        q_rot = q * cos_q + q_rh * sin_q                         # (T, Q_SIZE)
        k_rot = k * cos_k + k_rh * sin_k                         # (T, KV_SIZE)

        # ---- causal GQA attention: batch the G q heads of each kv group on
        # the sublane axis -> one score dot and one p@v dot per kv head.
        group_outs = []
        for kvh in range(N_KV_HEADS):
            qbase = kvh * G * HEAD_DIM
            q_g = jnp.concatenate(
                [q_rot[:, qbase + g * HEAD_DIM: qbase + (g + 1) * HEAD_DIM]
                 for g in range(G)], axis=0).astype(jnp.bfloat16)   # (G*T, D)
            kh = k_rot[:, kvh * HEAD_DIM:(kvh + 1) * HEAD_DIM].astype(jnp.bfloat16)
            vh = v[:, kvh * HEAD_DIM:(kvh + 1) * HEAD_DIM].astype(jnp.bfloat16)

            s = jax.lax.dot_general(
                q_g, kh, dimension_numbers=(((1,), (1,)), ((), ())),
                preferred_element_type=jnp.float32)                 # (G*T, T)
            s = jnp.where(causal, s, NEG_INF)
            s = s - jnp.max(s, axis=-1, keepdims=True)
            p = jnp.exp(s)
            # EUP approximate reciprocal instead of a VALU divide
            p = p * pl.reciprocal(jnp.sum(p, axis=-1, keepdims=True),
                                  approx=True)
            og = jnp.dot(p.astype(jnp.bfloat16), vh,
                         preferred_element_type=jnp.float32)        # (G*T, D)
            # unstack the G heads back onto lanes -> (T, G*HEAD_DIM)
            group_outs.append(jnp.concatenate(
                [og[g * T:(g + 1) * T, :] for g in range(G)], axis=-1))

        # ---- single packed o_proj matmul per layer ----------------------------
        attn_packed = jnp.concatenate(group_outs, axis=-1)           # (T, Q_SIZE)
        attn_out = jnp.dot(attn_packed.astype(jnp.bfloat16), wo_ref[...],
                           preferred_element_type=jnp.float32)       # (T, HIDDEN)

        # ---- post_attention_layernorm (fused add-residual) -------------------
        residual = attn_out + residual
        x = _rmsnorm(residual, w_post_ref[...])

        # ---- SwiGLU MLP -------------------------------------------------------
        gu = jnp.dot(x.astype(jnp.bfloat16), wgu_ref[...],
                     preferred_element_type=jnp.float32)             # (T, 2*INTER)
        gate = gu[:, :INTER]
        up = gu[:, INTER:]
        hmid = jax.nn.silu(gate) * up                                # f32
        h = jnp.dot(hmid.astype(jnp.bfloat16), wdown_ref[...],
                    preferred_element_type=jnp.float32)              # (T, HIDDEN)

    # ---- final norm + lm_head for the LAST position only (LogitsProcessor) ---
    last = (h + residual)[T - 1:T, :]                                # (1, HIDDEN)
    final = _rmsnorm(last, final_norm_ref[...])
    out_ref[...] = jnp.dot(final.astype(jnp.bfloat16), lm_head_ref[...],
                           preferred_element_type=jnp.float32)       # (1, VOCAB)


# ------------------------------- host-side glue --------------------------------
def _rotate_half_cols(w, n_heads):
    # Columns such that x @ result == rotate_half(x @ w) per head (neox style):
    # per head [-x2, x1].  Exact permutation + negation of w's columns.
    cols = []
    for hd in range(n_heads):
        wh = w[:, hd * HEAD_DIM:(hd + 1) * HEAD_DIM]
        cols.append(jnp.concatenate([-wh[:, HALF:], wh[:, :HALF]], axis=1))
    return jnp.concatenate(cols, axis=1)


def init_params(key):
    def w(k, shape):
        return jax.random.normal(k, shape, jnp.float32) * 0.02

    keys = jax.random.split(key, 2 + N_LAYERS)
    params = {
        "embed": w(keys[0], (VOCAB, HIDDEN)).astype(jnp.bfloat16),
        "lm_head": w(keys[1], (HIDDEN, VOCAB)).astype(jnp.bfloat16),
        "final_norm": jnp.ones((1, HIDDEN), jnp.float32),
        "layers": [],
    }
    for i in range(N_LAYERS):
        lk = jax.random.split(keys[2 + i], 4)
        wqkv = w(lk[0], (HIDDEN, QKV_OUT))
        wq = wqkv[:, :Q_SIZE] * SCALE                  # fold attention scale
        wk = wqkv[:, Q_SIZE:Q_SIZE + KV_SIZE]
        wv = wqkv[:, Q_SIZE + KV_SIZE:]
        wqkv_ext = jnp.concatenate(
            [wq, wk, wv,
             _rotate_half_cols(wq, N_HEADS),
             _rotate_half_cols(wk, N_KV_HEADS)], axis=1).astype(jnp.bfloat16)
        params["layers"].append({
            "input_norm": jnp.ones((1, HIDDEN), jnp.float32),
            "post_norm": jnp.ones((1, HIDDEN), jnp.float32),
            "wqkv_ext": wqkv_ext,                        # (HIDDEN, 224) bf16
            "wo": w(lk[1], (Q_SIZE, HIDDEN)).astype(jnp.bfloat16),
            "wgu": w(lk[2], (HIDDEN, 2 * INTER)).astype(jnp.bfloat16),
            "wdown": w(lk[3], (INTER, HIDDEN)).astype(jnp.bfloat16),
        })
    return params


def llama_forward(params, input_ids, positions):
    T = input_ids.shape[0]
    ids2d = input_ids.reshape(T, 1).astype(jnp.int32)

    # RoPE cos/sin computed once per forward, pre-broadcast to packed widths.
    inv_freq = 1.0 / (ROPE_THETA ** (jnp.arange(HALF, dtype=jnp.float32) / HALF))
    freqs = positions.astype(jnp.float32)[:, None] * inv_freq[None, :]  # (T, HALF)
    cos = jnp.cos(freqs)
    sin = jnp.sin(freqs)
    cos_hd = jnp.concatenate([cos, cos], axis=-1)       # (T, HEAD_DIM)
    sin_hd = jnp.concatenate([sin, sin], axis=-1)
    cos_q = jnp.tile(cos_hd, (1, N_HEADS))              # (T, Q_SIZE)
    sin_q = jnp.tile(sin_hd, (1, N_HEADS))
    cos_k = jnp.tile(cos_hd, (1, N_KV_HEADS))           # (T, KV_SIZE)
    sin_k = jnp.tile(sin_hd, (1, N_KV_HEADS))

    flat = []
    for lp in params["layers"]:
        flat += [lp["input_norm"], lp["post_norm"], lp["wqkv_ext"],
                 lp["wo"], lp["wgu"], lp["wdown"]]
    n_in = 8 + len(flat)

    # Advisory cost estimate so XLA schedules around the fused custom call.
    flops_layer = (2 * T * HIDDEN * QKV_EXT
                   + N_KV_HEADS * (2 * 2 * (G * T) * T * HEAD_DIM)
                   + 2 * T * Q_SIZE * HIDDEN
                   + 2 * T * HIDDEN * 2 * INTER
                   + 2 * T * INTER * HIDDEN)
    flops = 2 * T * VOCAB * HIDDEN + N_LAYERS * flops_layer + 2 * HIDDEN * VOCAB
    transc = N_LAYERS * (N_HEADS * T * T + T * INTER) + (2 * N_LAYERS + 1) * T
    bytes_acc = (VOCAB * HIDDEN * 2 + HIDDEN * VOCAB * 2 + VOCAB * 4
                 + N_LAYERS * 2 * (HIDDEN * QKV_EXT + Q_SIZE * HIDDEN
                                   + HIDDEN * 2 * INTER + INTER * HIDDEN)
                 + (2 * N_LAYERS + 1) * HIDDEN * 4
                 + 2 * T * (Q_SIZE + KV_SIZE) * 4 + T * 4)

    # TODO(synk): for realistic configs, stream layer weights via a grid axis
    # over layers (BlockSpec index_map + double buffering; ~32 MiB budget on
    # v7x) and add a "parallel" grid axis so both v7x TensorCores are used;
    # at this toy size everything fits in VMEM and a single fused call wins.
    logits = pl.pallas_call(
        _llama_fwd_kernel,
        out_shape=jax.ShapeDtypeStruct((1, VOCAB), jnp.float32),
        in_specs=[_vmem()] * n_in,
        out_specs=_vmem(),
        cost_estimate=pl.CostEstimate(flops=flops, transcendentals=transc,
                                      bytes_accessed=bytes_acc),
    )(ids2d, cos_q, sin_q, cos_k, sin_k, params["embed"], params["lm_head"],
      params["final_norm"], *flat)

    # LogitsProcessor: next-token logits from the last position (already the
    # only row the kernel computes/writes).
    return logits


# TODO(synk): RadixAttention's paged KV cache / ForwardBatch plumbing,
# tensor-parallel sharding, the Pooler(get_embedding) path and HF weight
# loading have no standalone equivalent here; attention is a dense
# single-device causal prefill over the whole (small) sequence, run gridless
# in a single fused pallas_call since everything fits in VMEM.

if __name__ == "__main__":
    key = jax.random.PRNGKey(0)
    pkey, ikey = jax.random.split(key)
    params = init_params(pkey)

    T = 8
    input_ids = jax.random.randint(ikey, (T,), 0, VOCAB, dtype=jnp.int32)
    positions = jnp.arange(T, dtype=jnp.int32)

    logits = jax.jit(llama_forward)(params, input_ids, positions)
    jax.block_until_ready(logits)
    assert logits.shape == (1, VOCAB)
    assert bool(jnp.all(jnp.isfinite(logits)))
    print("KERNEL_OK")
</pallas_src>

<mosaic_0001>
module attributes {stable_mosaic.version = 11 : i64} {
  func.func @_llama_fwd_kernel(%arg0: memref<8x1xi32, #tpu.memory_space<vmem>>, %arg1: memref<8x64xf32, #tpu.memory_space<vmem>>, %arg2: memref<8x64xf32, #tpu.memory_space<vmem>>, %arg3: memref<8x32xf32, #tpu.memory_space<vmem>>, %arg4: memref<8x32xf32, #tpu.memory_space<vmem>>, %arg5: memref<256x64xbf16, #tpu.memory_space<vmem>>, %arg6: memref<64x256xbf16, #tpu.memory_space<vmem>>, %arg7: memref<1x64xf32, #tpu.memory_space<vmem>>, %arg8: memref<1x64xf32, #tpu.memory_space<vmem>>, %arg9: memref<1x64xf32, #tpu.memory_space<vmem>>, %arg10: memref<64x224xbf16, #tpu.memory_space<vmem>>, %arg11: memref<64x64xbf16, #tpu.memory_space<vmem>>, %arg12: memref<64x256xbf16, #tpu.memory_space<vmem>>, %arg13: memref<128x64xbf16, #tpu.memory_space<vmem>>, %arg14: memref<1x64xf32, #tpu.memory_space<vmem>>, %arg15: memref<1x64xf32, #tpu.memory_space<vmem>>, %arg16: memref<64x224xbf16, #tpu.memory_space<vmem>>, %arg17: memref<64x64xbf16, #tpu.memory_space<vmem>>, %arg18: memref<64x256xbf16, #tpu.memory_space<vmem>>, %arg19: memref<128x64xbf16, #tpu.memory_space<vmem>>, %arg20: memref<1x256xf32, #tpu.memory_space<vmem>>) attributes {dimension_semantics = [], scalar_prefetch = 0 : i64, scratch_operands = 0 : i64, tpu.core_type = #tpu.core_type<tc>} {
    %c0 = arith.constant 0 : index
    %c0_0 = arith.constant 0 : index
    %0 = vector.load %arg0[%c0, %c0_0] : memref<8x1xi32, #tpu.memory_space<vmem>>, vector<8x1xi32>
    %1 = tpu.iota {dimensions = array<i32: 1>} : vector<8x256xi32>
    %2 = vector.broadcast %0 : vector<8x1xi32> to vector<8x256xi32>
    %3 = arith.cmpi eq, %1, %2 : vector<8x256xi32>
    %4 = arith.extui %3 : vector<8x256xi1> to vector<8x256xi32>
    %5 = arith.sitofp %4 : vector<8x256xi32> to vector<8x256xf32>
    %6 = arith.truncf %5 : vector<8x256xf32> to vector<8x256xbf16>
    %c0_1 = arith.constant 0 : index
    %c0_2 = arith.constant 0 : index
    %7 = vector.load %arg5[%c0_1, %c0_2] : memref<256x64xbf16, #tpu.memory_space<vmem>>, vector<256x64xbf16>
    %cst = arith.constant dense<0.000000e+00> : vector<8x64xf32>
    %8 = tpu.matmul %6, %7, %cst {dimension_numbers = #tpu.dot_dimension_numbers<[1], [0], [0], [1], [0, 0, 1, 1], [], []>} : vector<8x256xbf16>, vector<256x64xbf16>, vector<8x64xf32> -> vector<8x64xf32>
    %c0_3 = arith.constant 0 : index
    %c0_4 = arith.constant 0 : index
    %9 = vector.load %arg1[%c0_3, %c0_4] : memref<8x64xf32, #tpu.memory_space<vmem>>, vector<8x64xf32>
    %c0_5 = arith.constant 0 : index
    %c0_6 = arith.constant 0 : index
    %10 = vector.load %arg2[%c0_5, %c0_6] : memref<8x64xf32, #tpu.memory_space<vmem>>, vector<8x64xf32>
    %c0_7 = arith.constant 0 : index
    %c0_8 = arith.constant 0 : index
    %11 = vector.load %arg3[%c0_7, %c0_8] : memref<8x32xf32, #tpu.memory_space<vmem>>, vector<8x32xf32>
    %c0_9 = arith.constant 0 : index
    %c0_10 = arith.constant 0 : index
    %12 = vector.load %arg4[%c0_9, %c0_10] : memref<8x32xf32, #tpu.memory_space<vmem>>, vector<8x32xf32>
    %13 = tpu.iota {dimensions = array<i32: 0>} : vector<16x8xi32>
    %14 = tpu.iota {dimensions = array<i32: 1>} : vector<16x8xi32>
    %c8_i32 = arith.constant 8 : i32
    %c0_i32 = arith.constant 0 : i32
    %15 = arith.cmpi eq, %c8_i32, %c0_i32 : i32
    %c1_i32 = arith.constant 1 : i32
    %16 = arith.select %15, %c1_i32, %c8_i32 : i32
    %17 = vector.broadcast %16 : i32 to vector<16x8xi32>
    %18 = arith.remsi %13, %17 : vector<16x8xi32>
    %c0_i32_11 = arith.constant 0 : i32
    %19 = vector.broadcast %c0_i32_11 : i32 to vector<16x8xi32>
    %20 = arith.cmpi ne, %18, %19 : vector<16x8xi32>
    %c0_i32_12 = arith.constant 0 : i32
    %21 = vector.broadcast %c0_i32_12 : i32 to vector<16x8xi32>
    %22 = arith.cmpi slt, %18, %21 : vector<16x8xi32>
    %c0_i32_13 = arith.constant 0 : i32
    %23 = arith.cmpi slt, %16, %c0_i32_13 : i32
    %24 = vector.broadcast %23 : i1 to vector<16x8xi1>
    %25 = vector.broadcast %24 : vector<16x8xi1> to vector<16x8xi1>
    %26 = arith.xori %22, %25 : vector<16x8xi1>
    %27 = arith.andi %26, %20 : vector<16x8xi1>
    %28 = vector.broadcast %16 : i32 to vector<16x8xi32>
    %29 = arith.addi %18, %28 : vector<16x8xi32>
    %30 = arith.select %27, %29, %18 : vector<16x8xi1>, vector<16x8xi32>
    %31 = arith.cmpi sle, %14, %30 : vector<16x8xi32>
    %c0_14 = arith.constant 0 : index
    %c0_15 = arith.constant 0 : index
    %32 = vector.load %arg8[%c0_14, %c0_15] : memref<1x64xf32, #tpu.memory_space<vmem>>, vector<1x64xf32>
    %33 = arith.mulf %8, %8 : vector<8x64xf32>
    %cst_16 = arith.constant dense<0.000000e+00> : vector<8xf32>
    %34 = vector.multi_reduction <add>, %33, %cst_16 [1] : vector<8x64xf32> to vector<8xf32>
    %35 = vector.shape_cast %34 : vector<8xf32> to vector<8x1xf32>
    %cst_17 = arith.constant 6.400000e+01 : f32
    %36 = vector.broadcast %cst_17 : f32 to vector<8x1xf32>
    %37 = arith.divf %35, %36 : vector<8x1xf32>
    %cst_18 = arith.constant 9.99999997E-7 : f32
    %38 = vector.broadcast %cst_18 : f32 to vector<8x1xf32>
    %39 = arith.addf %37, %38 : vector<8x1xf32>
    %40 = math.rsqrt %39 : vector<8x1xf32>
    %41 = vector.broadcast %40 : vector<8x1xf32> to vector<8x64xf32>
    %42 = arith.mulf %8, %41 : vector<8x64xf32>
    %43 = vector.broadcast %32 : vector<1x64xf32> to vector<8x64xf32>
    %44 = arith.mulf %42, %43 : vector<8x64xf32>
    %45 = arith.truncf %44 : vector<8x64xf32> to vector<8x64xbf16>
    %c0_19 = arith.constant 0 : index
    %c0_20 = arith.constant 0 : index
    %46 = vector.load %arg10[%c0_19, %c0_20] : memref<64x224xbf16, #tpu.memory_space<vmem>>, vector<64x224xbf16>
    %cst_21 = arith.constant dense<0.000000e+00> : vector<8x224xf32>
    %47 = tpu.matmul %45, %46, %cst_21 {dimension_numbers = #tpu.dot_dimension_numbers<[1], [0], [0], [1], [0, 0, 1, 1], [], []>} : vector<8x64xbf16>, vector<64x224xbf16>, vector<8x224xf32> -> vector<8x224xf32>
    %48 = vector.extract_strided_slice %47 {offsets = [0, 0], sizes = [8, 64], strides = [1, 1]} : vector<8x224xf32> to vector<8x64xf32>
    %49 = vector.extract_strided_slice %47 {offsets = [0, 64], sizes = [8, 32], strides = [1, 1]} : vector<8x224xf32> to vector<8x32xf32>
    %50 = vector.extract_strided_slice %47 {offsets = [0, 96], sizes = [8, 32], strides = [1, 1]} : vector<8x224xf32> to vector<8x32xf32>
    %51 = vector.extract_strided_slice %47 {offsets = [0, 128], sizes = [8, 64], strides = [1, 1]} : vector<8x224xf32> to vector<8x64xf32>
    %52 = vector.extract_strided_slice %47 {offsets = [0, 192], sizes = [8, 32], strides = [1, 1]} : vector<8x224xf32> to vector<8x32xf32>
    %53 = arith.mulf %48, %9 : vector<8x64xf32>
    %54 = arith.mulf %51, %10 : vector<8x64xf32>
    %55 = arith.addf %53, %54 : vector<8x64xf32>
    %56 = arith.mulf %49, %11 : vector<8x32xf32>
    %57 = arith.mulf %52, %12 : vector<8x32xf32>
    %58 = arith.addf %56, %57 : vector<8x32xf32>
    %59 = vector.extract_strided_slice %55 {offsets = [0, 0], sizes = [8, 16], strides = [1, 1]} : vector<8x64xf32> to vector<8x16xf32>
    %60 = vector.extract_strided_slice %55 {offsets = [0, 16], sizes = [8, 16], strides = [1, 1]} : vector<8x64xf32> to vector<8x16xf32>
    %61 = tpu.concatenate %59, %60 in 0 : vector<8x16xf32>, vector<8x16xf32> -> vector<16x16xf32>
    %62 = arith.truncf %61 : vector<16x16xf32> to vector<16x16xbf16>
    %63 = vector.extract_strided_slice %58 {offsets = [0, 0], sizes = [8, 16], strides = [1, 1]} : vector<8x32xf32> to vector<8x16xf32>
    %64 = arith.truncf %63 : vector<8x16xf32> to vector<8x16xbf16>
    %65 = vector.extract_strided_slice %50 {offsets = [0, 0], sizes = [8, 16], strides = [1, 1]} : vector<8x32xf32> to vector<8x16xf32>
    %66 = arith.truncf %65 : vector<8x16xf32> to vector<8x16xbf16>
    %cst_22 = arith.constant dense<0.000000e+00> : vector<16x8xf32>
    %67 = tpu.matmul %62, %64, %cst_22 {dimension_numbers = #tpu.dot_dimension_numbers<[1], [1], [0], [0], [0, 0, 1, 0], [], []>} : vector<16x16xbf16>, vector<8x16xbf16>, vector<16x8xf32> -> vector<16x8xf32>
    %cst_23 = arith.constant -1.000000e+30 : f32
    %68 = vector.broadcast %cst_23 : f32 to vector<16x8xf32>
    %69 = arith.select %31, %67, %68 : vector<16x8xi1>, vector<16x8xf32>
    %cst_24 = arith.constant dense<0xFF800000> : vector<16xf32>
    %70 = vector.multi_reduction <maximumf>, %69, %cst_24 [1] : vector<16x8xf32> to vector<16xf32>
    %71 = vector.shape_cast %70 : vector<16xf32> to vector<16x1xf32>
    %72 = vector.broadcast %71 : vector<16x1xf32> to vector<16x8xf32>
    %73 = arith.subf %69, %72 : vector<16x8xf32>
    %74 = math.exp %73 : vector<16x8xf32>
    %cst_25 = arith.constant dense<0.000000e+00> : vector<16xf32>
    %75 = vector.multi_reduction <add>, %74, %cst_25 [1] : vector<16x8xf32> to vector<16xf32>
    %76 = vector.shape_cast %75 : vector<16xf32> to vector<16x1xf32>
    %77 = tpu.reciprocal %76 {approx = true} : vector<16x1xf32> -> vector<16x1xf32>
    %78 = vector.broadcast %77 : vector<16x1xf32> to vector<16x8xf32>
    %79 = arith.mulf %74, %78 : vector<16x8xf32>
    %80 = arith.truncf %79 : vector<16x8xf32> to vector<16x8xbf16>
    %cst_26 = arith.constant dense<0.000000e+00> : vector<16x16xf32>
    %81 = tpu.matmul %80, %66, %cst_26 {dimension_numbers = #tpu.dot_dimension_numbers<[1], [0], [0], [1], [0, 0, 1, 1], [], []>} : vector<16x8xbf16>, vector<8x16xbf16>, vector<16x16xf32> -> vector<16x16xf32>
    %82 = vector.extract_strided_slice %81 {offsets = [0, 0], sizes = [8, 16], strides = [1, 1]} : vector<16x16xf32> to vector<8x16xf32>
    %83 = vector.extract_strided_slice %81 {offsets = [8, 0], sizes = [8, 16], strides = [1, 1]} : vector<16x16xf32> to vector<8x16xf32>
    %84 = tpu.concatenate %82, %83 in 1 : vector<8x16xf32>, vector<8x16xf32> -> vector<8x32xf32>
    %85 = vector.extract_strided_slice %55 {offsets = [0, 32], sizes = [8, 16], strides = [1, 1]} : vector<8x64xf32> to vector<8x16xf32>
    %86 = vector.extract_strided_slice %55 {offsets = [0, 48], sizes = [8, 16], strides = [1, 1]} : vector<8x64xf32> to vector<8x16xf32>
    %87 = tpu.concatenate %85, %86 in 0 : vector<8x16xf32>, vector<8x16xf32> -> vector<16x16xf32>
    %88 = arith.truncf %87 : vector<16x16xf32> to vector<16x16xbf16>
    %89 = vector.extract_strided_slice %58 {offsets = [0, 16], sizes = [8, 16], strides = [1, 1]} : vector<8x32xf32> to vector<8x16xf32>
    %90 = arith.truncf %89 : vector<8x16xf32> to vector<8x16xbf16>
    %91 = vector.extract_strided_slice %50 {offsets = [0, 16], sizes = [8, 16], strides = [1, 1]} : vector<8x32xf32> to vector<8x16xf32>
    %92 = arith.truncf %91 : vector<8x16xf32> to vector<8x16xbf16>
    %cst_27 = arith.constant dense<0.000000e+00> : vector<16x8xf32>
    %93 = tpu.matmul %88, %90, %cst_27 {dimension_numbers = #tpu.dot_dimension_numbers<[1], [1], [0], [0], [0, 0, 1, 0], [], []>} : vector<16x16xbf16>, vector<8x16xbf16>, vector<16x8xf32> -> vector<16x8xf32>
    %cst_28 = arith.constant -1.000000e+30 : f32
    %94 = vector.broadcast %cst_28 : f32 to vector<16x8xf32>
    %95 = arith.select %31, %93, %94 : vector<16x8xi1>, vector<16x8xf32>
    %cst_29 = arith.constant dense<0xFF800000> : vector<16xf32>
    %96 = vector.multi_reduction <maximumf>, %95, %cst_29 [1] : vector<16x8xf32> to vector<16xf32>
    %97 = vector.shape_cast %96 : vector<16xf32> to vector<16x1xf32>
    %98 = vector.broadcast %97 : vector<16x1xf32> to vector<16x8xf32>
    %99 = arith.subf %95, %98 : vector<16x8xf32>
    %100 = math.exp %99 : vector<16x8xf32>
    %cst_30 = arith.constant dense<0.000000e+00> : vector<16xf32>
    %101 = vector.multi_reduction <add>, %100, %cst_30 [1] : vector<16x8xf32> to vector<16xf32>
    %102 = vector.shape_cast %101 : vector<16xf32> to vector<16x1xf32>
    %103 = tpu.reciprocal %102 {approx = true} : vector<16x1xf32> -> vector<16x1xf32>
    %104 = vector.broadcast %103 : vector<16x1xf32> to vector<16x8xf32>
    %105 = arith.mulf %100, %104 : vector<16x8xf32>
    %106 = arith.truncf %105 : vector<16x8xf32> to vector<16x8xbf16>
    %cst_31 = arith.constant dense<0.000000e+00> : vector<16x16xf32>
    %107 = tpu.matmul %106, %92, %cst_31 {dimension_numbers = #tpu.dot_dimension_numbers<[1], [0], [0], [1], [0, 0, 1, 1], [], []>} : vector<16x8xbf16>, vector<8x16xbf16>, vector<16x16xf32> -> vector<16x16xf32>
    %108 = vector.extract_strided_slice %107 {offsets = [0, 0], sizes = [8, 16], strides = [1, 1]} : vector<16x16xf32> to vector<8x16xf32>
    %109 = vector.extract_strided_slice %107 {offsets = [8, 0], sizes = [8, 16], strides = [1, 1]} : vector<16x16xf32> to vector<8x16xf32>
    %110 = tpu.concatenate %108, %109 in 1 : vector<8x16xf32>, vector<8x16xf32> -> vector<8x32xf32>
    %111 = tpu.concatenate %84, %110 in 1 : vector<8x32xf32>, vector<8x32xf32> -> vector<8x64xf32>
    %112 = arith.truncf %111 : vector<8x64xf32> to vector<8x64xbf16>
    %c0_32 = arith.constant 0 : index
    %c0_33 = arith.constant 0 : index
    %113 = vector.load %arg11[%c0_32, %c0_33] : memref<64x64xbf16, #tpu.memory_space<vmem>>, vector<64x64xbf16>
    %cst_34 = arith.constant dense<0.000000e+00> : vector<8x64xf32>
    %114 = tpu.matmul %112, %113, %cst_34 {dimension_numbers = #tpu.dot_dimension_numbers<[1], [0], [0], [1], [0, 0, 1, 1], [], []>} : vector<8x64xbf16>, vector<64x64xbf16>, vector<8x64xf32> -> vector<8x64xf32>
    %115 = arith.addf %114, %8 : vector<8x64xf32>
    %c0_35 = arith.constant 0 : index
    %c0_36 = arith.constant 0 : index
    %116 = vector.load %arg9[%c0_35, %c0_36] : memref<1x64xf32, #tpu.memory_space<vmem>>, vector<1x64xf32>
    %117 = arith.mulf %115, %115 : vector<8x64xf32>
    %cst_37 = arith.constant dense<0.000000e+00> : vector<8xf32>
    %118 = vector.multi_reduction <add>, %117, %cst_37 [1] : vector<8x64xf32> to vector<8xf32>
    %119 = vector.shape_cast %118 : vector<8xf32> to vector<8x1xf32>
    %cst_38 = arith.constant 6.400000e+01 : f32
    %120 = vector.broadcast %cst_38 : f32 to vector<8x1xf32>
    %121 = arith.divf %119, %120 : vector<8x1xf32>
    %cst_39 = arith.constant 9.99999997E-7 : f32
    %122 = vector.broadcast %cst_39 : f32 to vector<8x1xf32>
    %123 = arith.addf %121, %122 : vector<8x1xf32>
    %124 = math.rsqrt %123 : vector<8x1xf32>
    %125 = vector.broadcast %124 : vector<8x1xf32> to vector<8x64xf32>
    %126 = arith.mulf %115, %125 : vector<8x64xf32>
    %127 = vector.broadcast %116 : vector<1x64xf32> to vector<8x64xf32>
    %128 = arith.mulf %126, %127 : vector<8x64xf32>
    %129 = arith.truncf %128 : vector<8x64xf32> to vector<8x64xbf16>
    %c0_40 = arith.constant 0 : index
    %c0_41 = arith.constant 0 : index
    %130 = vector.load %arg12[%c0_40, %c0_41] : memref<64x256xbf16, #tpu.memory_space<vmem>>, vector<64x256xbf16>
    %cst_42 = arith.constant dense<0.000000e+00> : vector<8x256xf32>
    %131 = tpu.matmul %129, %130, %cst_42 {dimension_numbers = #tpu.dot_dimension_numbers<[1], [0], [0], [1], [0, 0, 1, 1], [], []>} : vector<8x64xbf16>, vector<64x256xbf16>, vector<8x256xf32> -> vector<8x256xf32>
    %132 = vector.extract_strided_slice %131 {offsets = [0, 0], sizes = [8, 128], strides = [1, 1]} : vector<8x256xf32> to vector<8x128xf32>
    %133 = vector.extract_strided_slice %131 {offsets = [0, 128], sizes = [8, 128], strides = [1, 1]} : vector<8x256xf32> to vector<8x128xf32>
    %134 = arith.negf %132 : vector<8x128xf32>
    %135 = math.exp %134 : vector<8x128xf32>
    %cst_43 = arith.constant 1.000000e+00 : f32
    %136 = vector.broadcast %cst_43 : f32 to vector<8x128xf32>
    %137 = arith.addf %136, %135 : vector<8x128xf32>
    %138 = arith.divf %136, %137 : vector<8x128xf32>
    %139 = arith.mulf %132, %138 : vector<8x128xf32>
    %140 = arith.mulf %139, %133 : vector<8x128xf32>
    %141 = arith.truncf %140 : vector<8x128xf32> to vector<8x128xbf16>
    %c0_44 = arith.constant 0 : index
    %c0_45 = arith.constant 0 : index
    %142 = vector.load %arg13[%c0_44, %c0_45] : memref<128x64xbf16, #tpu.memory_space<vmem>>, vector<128x64xbf16>
    %cst_46 = arith.constant dense<0.000000e+00> : vector<8x64xf32>
    %143 = tpu.matmul %141, %142, %cst_46 {dimension_numbers = #tpu.dot_dimension_numbers<[1], [0], [0], [1], [0, 0, 1, 1], [], []>} : vector<8x128xbf16>, vector<128x64xbf16>, vector<8x64xf32> -> vector<8x64xf32>
    %144 = arith.addf %143, %115 : vector<8x64xf32>
    %c0_47 = arith.constant 0 : index
    %c0_48 = arith.constant 0 : index
    %145 = vector.load %arg14[%c0_47, %c0_48] : memref<1x64xf32, #tpu.memory_space<vmem>>, vector<1x64xf32>
    %146 = arith.mulf %144, %144 : vector<8x64xf32>
    %cst_49 = arith.constant dense<0.000000e+00> : vector<8xf32>
    %147 = vector.multi_reduction <add>, %146, %cst_49 [1] : vector<8x64xf32> to vector<8xf32>
    %148 = vector.shape_cast %147 : vector<8xf32> to vector<8x1xf32>
    %cst_50 = arith.constant 6.400000e+01 : f32
    %149 = vector.broadcast %cst_50 : f32 to vector<8x1xf32>
    %150 = arith.divf %148, %149 : vector<8x1xf32>
    %cst_51 = arith.constant 9.99999997E-7 : f32
    %151 = vector.broadcast %cst_51 : f32 to vector<8x1xf32>
    %152 = arith.addf %150, %151 : vector<8x1xf32>
    %153 = math.rsqrt %152 : vector<8x1xf32>
    %154 = vector.broadcast %153 : vector<8x1xf32> to vector<8x64xf32>
    %155 = arith.mulf %144, %154 : vector<8x64xf32>
    %156 = vector.broadcast %145 : vector<1x64xf32> to vector<8x64xf32>
    %157 = arith.mulf %155, %156 : vector<8x64xf32>
    %158 = arith.truncf %157 : vector<8x64xf32> to vector<8x64xbf16>
    %c0_52 = arith.constant 0 : index
    %c0_53 = arith.constant 0 : index
    %159 = vector.load %arg16[%c0_52, %c0_53] : memref<64x224xbf16, #tpu.memory_space<vmem>>, vector<64x224xbf16>
    %cst_54 = arith.constant dense<0.000000e+00> : vector<8x224xf32>
    %160 = tpu.matmul %158, %159, %cst_54 {dimension_numbers = #tpu.dot_dimension_numbers<[1], [0], [0], [1], [0, 0, 1, 1], [], []>} : vector<8x64xbf16>, vector<64x224xbf16>, vector<8x224xf32> -> vector<8x224xf32>
    %161 = vector.extract_strided_slice %160 {offsets = [0, 0], sizes = [8, 64], strides = [1, 1]} : vector<8x224xf32> to vector<8x64xf32>
    %162 = vector.extract_strided_slice %160 {offsets = [0, 64], sizes = [8, 32], strides = [1, 1]} : vector<8x224xf32> to vector<8x32xf32>
    %163 = vector.extract_strided_slice %160 {offsets = [0, 96], sizes = [8, 32], strides = [1, 1]} : vector<8x224xf32> to vector<8x32xf32>
    %164 = vector.extract_strided_slice %160 {offsets = [0, 128], sizes = [8, 64], strides = [1, 1]} : vector<8x224xf32> to vector<8x64xf32>
    %165 = vector.extract_strided_slice %160 {offsets = [0, 192], sizes = [8, 32], strides = [1, 1]} : vector<8x224xf32> to vector<8x32xf32>
    %166 = arith.mulf %161, %9 : vector<8x64xf32>
    %167 = arith.mulf %164, %10 : vector<8x64xf32>
    %168 = arith.addf %166, %167 : vector<8x64xf32>
    %169 = arith.mulf %162, %11 : vector<8x32xf32>
    %170 = arith.mulf %165, %12 : vector<8x32xf32>
    %171 = arith.addf %169, %170 : vector<8x32xf32>
    %172 = vector.extract_strided_slice %168 {offsets = [0, 0], sizes = [8, 16], strides = [1, 1]} : vector<8x64xf32> to vector<8x16xf32>
    %173 = vector.extract_strided_slice %168 {offsets = [0, 16], sizes = [8, 16], strides = [1, 1]} : vector<8x64xf32> to vector<8x16xf32>
    %174 = tpu.concatenate %172, %173 in 0 : vector<8x16xf32>, vector<8x16xf32> -> vector<16x16xf32>
    %175 = arith.truncf %174 : vector<16x16xf32> to vector<16x16xbf16>
    %176 = vector.extract_strided_slice %171 {offsets = [0, 0], sizes = [8, 16], strides = [1, 1]} : vector<8x32xf32> to vector<8x16xf32>
    %177 = arith.truncf %176 : vector<8x16xf32> to vector<8x16xbf16>
    %178 = vector.extract_strided_slice %163 {offsets = [0, 0], sizes = [8, 16], strides = [1, 1]} : vector<8x32xf32> to vector<8x16xf32>
    %179 = arith.truncf %178 : vector<8x16xf32> to vector<8x16xbf16>
    %cst_55 = arith.constant dense<0.000000e+00> : vector<16x8xf32>
    %180 = tpu.matmul %175, %177, %cst_55 {dimension_numbers = #tpu.dot_dimension_numbers<[1], [1], [0], [0], [0, 0, 1, 0], [], []>} : vector<16x16xbf16>, vector<8x16xbf16>, vector<16x8xf32> -> vector<16x8xf32>
    %cst_56 = arith.constant -1.000000e+30 : f32
    %181 = vector.broadcast %cst_56 : f32 to vector<16x8xf32>
    %182 = arith.select %31, %180, %181 : vector<16x8xi1>, vector<16x8xf32>
    %cst_57 = arith.constant dense<0xFF800000> : vector<16xf32>
    %183 = vector.multi_reduction <maximumf>, %182, %cst_57 [1] : vector<16x8xf32> to vector<16xf32>
    %184 = vector.shape_cast %183 : vector<16xf32> to vector<16x1xf32>
    %185 = vector.broadcast %184 : vector<16x1xf32> to vector<16x8xf32>
    %186 = arith.subf %182, %185 : vector<16x8xf32>
    %187 = math.exp %186 : vector<16x8xf32>
    %cst_58 = arith.constant dense<0.000000e+00> : vector<16xf32>
    %188 = vector.multi_reduction <add>, %187, %cst_58 [1] : vector<16x8xf32> to vector<16xf32>
    %189 = vector.shape_cast %188 : vector<16xf32> to vector<16x1xf32>
    %190 = tpu.reciprocal %189 {approx = true} : vector<16x1xf32> -> vector<16x1xf32>
    %191 = vector.broadcast %190 : vector<16x1xf32> to vector<16x8xf32>
    %192 = arith.mulf %187, %191 : vector<16x8xf32>
    %193 = arith.truncf %192 : vector<16x8xf32> to vector<16x8xbf16>
    %cst_59 = arith.constant dense<0.000000e+00> : vector<16x16xf32>
    %194 = tpu.matmul %193, %179, %cst_59 {dimension_numbers = #tpu.dot_dimension_numbers<[1], [0], [0], [1], [0, 0, 1, 1], [], []>} : vector<16x8xbf16>, vector<8x16xbf16>, vector<16x16xf32> -> vector<16x16xf32>
    %195 = vector.extract_strided_slice %194 {offsets = [0, 0], sizes = [8, 16], strides = [1, 1]} : vector<16x16xf32> to vector<8x16xf32>
    %196 = vector.extract_strided_slice %194 {offsets = [8, 0], sizes = [8, 16], strides = [1, 1]} : vector<16x16xf32> to vector<8x16xf32>
    %197 = tpu.concatenate %195, %196 in 1 : vector<8x16xf32>, vector<8x16xf32> -> vector<8x32xf32>
    %198 = vector.extract_strided_slice %168 {offsets = [0, 32], sizes = [8, 16], strides = [1, 1]} : vector<8x64xf32> to vector<8x16xf32>
    %199 = vector.extract_strided_slice %168 {offsets = [0, 48], sizes = [8, 16], strides = [1, 1]} : vector<8x64xf32> to vector<8x16xf32>
    %200 = tpu.concatenate %198, %199 in 0 : vector<8x16xf32>, vector<8x16xf32> -> vector<16x16xf32>
    %201 = arith.truncf %200 : vector<16x16xf32> to vector<16x16xbf16>
    %202 = vector.extract_strided_slice %171 {offsets = [0, 16], sizes = [8, 16], strides = [1, 1]} : vector<8x32xf32> to vector<8x16xf32>
    %203 = arith.truncf %202 : vector<8x16xf32> to vector<8x16xbf16>
    %204 = vector.extract_strided_slice %163 {offsets = [0, 16], sizes = [8, 16], strides = [1, 1]} : vector<8x32xf32> to vector<8x16xf32>
    %205 = arith.truncf %204 : vector<8x16xf32> to vector<8x16xbf16>
    %cst_60 = arith.constant dense<0.000000e+00> : vector<16x8xf32>
    %206 = tpu.matmul %201, %203, %cst_60 {dimension_numbers = #tpu.dot_dimension_numbers<[1], [1], [0], [0], [0, 0, 1, 0], [], []>} : vector<16x16xbf16>, vector<8x16xbf16>, vector<16x8xf32> -> vector<16x8xf32>
    %cst_61 = arith.constant -1.000000e+30 : f32
    %207 = vector.broadcast %cst_61 : f32 to vector<16x8xf32>
    %208 = arith.select %31, %206, %207 : vector<16x8xi1>, vector<16x8xf32>
    %cst_62 = arith.constant dense<0xFF800000> : vector<16xf32>
    %209 = vector.multi_reduction <maximumf>, %208, %cst_62 [1] : vector<16x8xf32> to vector<16xf32>
    %210 = vector.shape_cast %209 : vector<16xf32> to vector<16x1xf32>
    %211 = vector.broadcast %210 : vector<16x1xf32> to vector<16x8xf32>
    %212 = arith.subf %208, %211 : vector<16x8xf32>
    %213 = math.exp %212 : vector<16x8xf32>
    %cst_63 = arith.constant dense<0.000000e+00> : vector<16xf32>
    %214 = vector.multi_reduction <add>, %213, %cst_63 [1] : vector<16x8xf32> to vector<16xf32>
    %215 = vector.shape_cast %214 : vector<16xf32> to vector<16x1xf32>
    %216 = tpu.reciprocal %215 {approx = true} : vector<16x1xf32> -> vector<16x1xf32>
    %217 = vector.broadcast %216 : vector<16x1xf32> to vector<16x8xf32>
    %218 = arith.mulf %213, %217 : vector<16x8xf32>
    %219 = arith.truncf %218 : vector<16x8xf32> to vector<16x8xbf16>
    %cst_64 = arith.constant dense<0.000000e+00> : vector<16x16xf32>
    %220 = tpu.matmul %219, %205, %cst_64 {dimension_numbers = #tpu.dot_dimension_numbers<[1], [0], [0], [1], [0, 0, 1, 1], [], []>} : vector<16x8xbf16>, vector<8x16xbf16>, vector<16x16xf32> -> vector<16x16xf32>
    %221 = vector.extract_strided_slice %220 {offsets = [0, 0], sizes = [8, 16], strides = [1, 1]} : vector<16x16xf32> to vector<8x16xf32>
    %222 = vector.extract_strided_slice %220 {offsets = [8, 0], sizes = [8, 16], strides = [1, 1]} : vector<16x16xf32> to vector<8x16xf32>
    %223 = tpu.concatenate %221, %222 in 1 : vector<8x16xf32>, vector<8x16xf32> -> vector<8x32xf32>
    %224 = tpu.concatenate %197, %223 in 1 : vector<8x32xf32>, vector<8x32xf32> -> vector<8x64xf32>
    %225 = arith.truncf %224 : vector<8x64xf32> to vector<8x64xbf16>
    %c0_65 = arith.constant 0 : index
    %c0_66 = arith.constant 0 : index
    %226 = vector.load %arg17[%c0_65, %c0_66] : memref<64x64xbf16, #tpu.memory_space<vmem>>, vector<64x64xbf16>
    %cst_67 = arith.constant dense<0.000000e+00> : vector<8x64xf32>
    %227 = tpu.matmul %225, %226, %cst_67 {dimension_numbers = #tpu.dot_dimension_numbers<[1], [0], [0], [1], [0, 0, 1, 1], [], []>} : vector<8x64xbf16>, vector<64x64xbf16>, vector<8x64xf32> -> vector<8x64xf32>
    %228 = arith.addf %227, %144 : vector<8x64xf32>
    %c0_68 = arith.constant 0 : index
    %c0_69 = arith.constant 0 : index
    %229 = vector.load %arg15[%c0_68, %c0_69] : memref<1x64xf32, #tpu.memory_space<vmem>>, vector<1x64xf32>
    %230 = arith.mulf %228, %228 : vector<8x64xf32>
    %cst_70 = arith.constant dense<0.000000e+00> : vector<8xf32>
    %231 = vector.multi_reduction <add>, %230, %cst_70 [1] : vector<8x64xf32> to vector<8xf32>
    %232 = vector.shape_cast %231 : vector<8xf32> to vector<8x1xf32>
    %cst_71 = arith.constant 6.400000e+01 : f32
    %233 = vector.broadcast %cst_71 : f32 to vector<8x1xf32>
    %234 = arith.divf %232, %233 : vector<8x1xf32>
    %cst_72 = arith.constant 9.99999997E-7 : f32
    %235 = vector.broadcast %cst_72 : f32 to vector<8x1xf32>
    %236 = arith.addf %234, %235 : vector<8x1xf32>
    %237 = math.rsqrt %236 : vector<8x1xf32>
    %238 = vector.broadcast %237 : vector<8x1xf32> to vector<8x64xf32>
    %239 = arith.mulf %228, %238 : vector<8x64xf32>
    %240 = vector.broadcast %229 : vector<1x64xf32> to vector<8x64xf32>
    %241 = arith.mulf %239, %240 : vector<8x64xf32>
    %242 = arith.truncf %241 : vector<8x64xf32> to vector<8x64xbf16>
    %c0_73 = arith.constant 0 : index
    %c0_74 = arith.constant 0 : index
    %243 = vector.load %arg18[%c0_73, %c0_74] : memref<64x256xbf16, #tpu.memory_space<vmem>>, vector<64x256xbf16>
    %cst_75 = arith.constant dense<0.000000e+00> : vector<8x256xf32>
    %244 = tpu.matmul %242, %243, %cst_75 {dimension_numbers = #tpu.dot_dimension_numbers<[1], [0], [0], [1], [0, 0, 1, 1], [], []>} : vector<8x64xbf16>, vector<64x256xbf16>, vector<8x256xf32> -> vector<8x256xf32>
    %245 = vector.extract_strided_slice %244 {offsets = [0, 0], sizes = [8, 128], strides = [1, 1]} : vector<8x256xf32> to vector<8x128xf32>
    %246 = vector.extract_strided_slice %244 {offsets = [0, 128], sizes = [8, 128], strides = [1, 1]} : vector<8x256xf32> to vector<8x128xf32>
    %247 = arith.negf %245 : vector<8x128xf32>
    %248 = math.exp %247 : vector<8x128xf32>
    %cst_76 = arith.constant 1.000000e+00 : f32
    %249 = vector.broadcast %cst_76 : f32 to vector<8x128xf32>
    %250 = arith.addf %249, %248 : vector<8x128xf32>
    %251 = arith.divf %249, %250 : vector<8x128xf32>
    %252 = arith.mulf %245, %251 : vector<8x128xf32>
    %253 = arith.mulf %252, %246 : vector<8x128xf32>
    %254 = arith.truncf %253 : vector<8x128xf32> to vector<8x128xbf16>
    %c0_77 = arith.constant 0 : index
    %c0_78 = arith.constant 0 : index
    %255 = vector.load %arg19[%c0_77, %c0_78] : memref<128x64xbf16, #tpu.memory_space<vmem>>, vector<128x64xbf16>
    %cst_79 = arith.constant dense<0.000000e+00> : vector<8x64xf32>
    %256 = tpu.matmul %254, %255, %cst_79 {dimension_numbers = #tpu.dot_dimension_numbers<[1], [0], [0], [1], [0, 0, 1, 1], [], []>} : vector<8x128xbf16>, vector<128x64xbf16>, vector<8x64xf32> -> vector<8x64xf32>
    %257 = arith.addf %256, %228 : vector<8x64xf32>
    %258 = vector.extract_strided_slice %257 {offsets = [7, 0], sizes = [1, 64], strides = [1, 1]} : vector<8x64xf32> to vector<1x64xf32>
    %c0_80 = arith.constant 0 : index
    %c0_81 = arith.constant 0 : index
    %259 = vector.load %arg7[%c0_80, %c0_81] : memref<1x64xf32, #tpu.memory_space<vmem>>, vector<1x64xf32>
    %260 = arith.mulf %258, %258 : vector<1x64xf32>
    %cst_82 = arith.constant dense<0.000000e+00> : vector<1xf32>
    %261 = vector.multi_reduction <add>, %260, %cst_82 [1] : vector<1x64xf32> to vector<1xf32>
    %262 = vector.shape_cast %261 : vector<1xf32> to vector<1x1xf32>
    %cst_83 = arith.constant 6.400000e+01 : f32
    %263 = vector.broadcast %cst_83 : f32 to vector<1x1xf32>
    %264 = arith.divf %262, %263 : vector<1x1xf32>
    %cst_84 = arith.constant 9.99999997E-7 : f32
    %265 = vector.broadcast %cst_84 : f32 to vector<1x1xf32>
    %266 = arith.addf %264, %265 : vector<1x1xf32>
    %267 = math.rsqrt %266 : vector<1x1xf32>
    %268 = vector.broadcast %267 : vector<1x1xf32> to vector<1x64xf32>
    %269 = arith.mulf %258, %268 : vector<1x64xf32>
    %270 = arith.mulf %269, %259 : vector<1x64xf32>
    %271 = arith.truncf %270 : vector<1x64xf32> to vector<1x64xbf16>
    %c0_85 = arith.constant 0 : index
    %c0_86 = arith.constant 0 : index
    %272 = vector.load %arg6[%c0_85, %c0_86] : memref<64x256xbf16, #tpu.memory_space<vmem>>, vector<64x256xbf16>
    %cst_87 = arith.constant dense<0.000000e+00> : vector<1x256xf32>
    %273 = tpu.matmul %271, %272, %cst_87 {dimension_numbers = #tpu.dot_dimension_numbers<[1], [0], [0], [1], [0, 0, 1, 1], [], []>} : vector<1x64xbf16>, vector<64x256xbf16>, vector<1x256xf32> -> vector<1x256xf32>
    %c0_88 = arith.constant 0 : index
    %c0_89 = arith.constant 0 : index
    %274 = vector.load %arg20[%c0_88, %c0_89] : memref<1x256xf32, #tpu.memory_space<vmem>>, vector<1x256xf32>
    tpu.vector_store %arg20[%c0_88, %c0_89], %273 {strides = array<i32>} : memref<1x256xf32, #tpu.memory_space<vmem>>, vector<1x256xf32>,
    return
  }
}

</mosaic_0001>

<bundles_post_ra>
// kernel: tile.34
= control target key start
LH: loop header
LB: loop body
LE: loop exit
PB: predicated region body
PF: predicated region fallthrough
CT: control target
= control target key end

     0   :  { %vm42_vm0 = vcmask 1047556   ;;  %vm44_vm1 = vcmask 130048   ;;  %vm54_vm2 = vcmask 261248   ;;  %s111_s0 = inlined_call_operand.vmem [shape: f32[8,2,16], index: 0, kind: input, shape index: {}]   ;;  %s112_s1 = inlined_call_operand.vmem [shape: f32[8,32], index: 1, kind: output, shape index: {}]  }
   0x1   :  { %v62_v0 = vld [vmem:[%s111_s0 + $0xe] sm:$0x3]  ;;  %v63_v1 = vld [vmem:[%s111_s0 + $0xc] sm:$0x3]  ;;  %v64_v2 = vld [vmem:[%s111_s0 + $0xa] sm:$0x3] }
   0x2   :  { %8 = vst [vmem:[#allocation0 + $0x38] sm:$0x3] %v62_v0  ;;  %13 = vst [vmem:[#allocation0 + $0x30] sm:$0x3] %v63_v1  ;;  %v65_v3 = vld [vmem:[%s111_s0 + $0x8] sm:$0x3] }
   0x3   :  { %18 = vst [vmem:[#allocation0 + $0x28] sm:$0x3] %v64_v2  ;;  %v66_v4 = vld [vmem:[%s111_s0 + $0x6] sm:$0x3]  ;;  %v67_v5 = vld [vmem:[%s111_s0 + $0x4] sm:$0x3] }
   0x4   :  { %23 = vst [vmem:[#allocation0 + $0x20] sm:$0x3] %v65_v3  ;;  %28 = vst [vmem:[#allocation0 + $0x18] sm:$0x3] %v66_v4  ;;  %v68_v6 = vld [vmem:[%s111_s0 + $0x2] sm:$0x3] }
   0x5   :  { %33 = vst [vmem:[#allocation0 + $0x10] sm:$0x3] %v67_v5  ;;  %v38_v7 = vld [vmem:[%s111_s0] sm:$0x3]  ;;  %37 = vst [vmem:[#allocation0 + $0x8] sm:$0x3] %v68_v6 }
   0x6   :  { %39 = vst [vmem:[#allocation0] sm:$0x3] %v38_v7  ;;  %s70_s0 = smov 16  }
   0xb   :  { %v41_v8 = vld [vmem:[#allocation0] ss:$8 sm:$0xf0]   ;;  %v49_v9 = vld [vmem:[#allocation0 + $0x1] ss:$8 sm:$0xf0]  }
   0xd   :  { %v40_v10 = vld [vmem:[#allocation0] ss:$8 sm:$0xf]   ;;  %v47_v11 = vld [vmem:[#allocation0 + $0x1] ss:$8 sm:$0xf]  }
   0xe   :  { %v43_v12 = vsel %vm42_vm0, %v41_v8, %v40_v10  ;;  %v51_v13 = vsel %vm42_vm0, %v49_v9, %v47_v11 }
   0xf   :  { %52 = vrot.lane.b32.xlu0 %v51_v13, %s70_s0  ;;  %45 = vst.msk [vmem:[%s112_s1] sm:$0xff] %vm44_vm1, %v43_v12  }
  0x81   :  { %v53_v14 = vpop.permute.xlu0 %52  }
  0x82   :  { %55 = vst.msk [vmem:[%s112_s1] sm:$0xff] %vm54_vm2, %v53_v14  }

// kernel: tile.29
= control target key start
LH: loop header
LB: loop body
LE: loop exit
PB: predicated region body
PF: predicated region fallthrough
CT: control target
= control target key end

     0   :  { %vm42_vm0 = vcmask 1047556   ;;  %vm44_vm1 = vcmask 130048   ;;  %s93_s22 = smov 16   ;;  %s94_s25 = smov 32   ;;  %vm54_vm2 = vcmask 523648   ;;  %vm64_vm3 = vcmask 392448   ;;  %s146_s0 = inlined_call_operand.vmem [shape: f32[8,4,16], index: 0, kind: input, shape index: {}]   ;;  %s147_s1 = inlined_call_operand.vmem [shape: f32[8,64], index: 1, kind: output, shape index: {}]  }
   0x1   :  { %v82_v0 = vld [vmem:[%s146_s0 + $0x1c] sm:$0xf]  ;;  %v83_v1 = vld [vmem:[%s146_s0 + $0x18] sm:$0xf]  ;;  %v84_v2 = vld [vmem:[%s146_s0 + $0x14] sm:$0xf] }
   0x2   :  { %8 = vst [vmem:[#allocation0 + $0x38] sm:$0xf] %v82_v0  ;;  %13 = vst [vmem:[#allocation0 + $0x30] sm:$0xf] %v83_v1  ;;  %v85_v3 = vld [vmem:[%s146_s0 + $0x10] sm:$0xf] }
   0x3   :  { %18 = vst [vmem:[#allocation0 + $0x28] sm:$0xf] %v84_v2  ;;  %v86_v4 = vld [vmem:[%s146_s0 + $0xc] sm:$0xf]  ;;  %v87_v5 = vld [vmem:[%s146_s0 + $0x8] sm:$0xf] }
   0x4   :  { %23 = vst [vmem:[#allocation0 + $0x20] sm:$0xf] %v85_v3  ;;  %28 = vst [vmem:[#allocation0 + $0x18] sm:$0xf] %v86_v4  ;;  %v88_v6 = vld [vmem:[%s146_s0 + $0x4] sm:$0xf] }
   0x5   :  { %33 = vst [vmem:[#allocation0 + $0x10] sm:$0xf] %v87_v5  ;;  %v38_v7 = vld [vmem:[%s146_s0] sm:$0xf]  ;;  %37 = vst [vmem:[#allocation0 + $0x8] sm:$0xf] %v88_v6 }
   0x6   :  { %39 = vst [vmem:[#allocation0] sm:$0xf] %v38_v7  ;;  %s92_s0 = smov 48   ;;  %vm74_vm4 = vcmask 261248  }
   0xb   :  { %v49_v8 = vld [vmem:[#allocation0 + $0x3] ss:$8 sm:$0xf0]   ;;  %v59_v9 = vld [vmem:[#allocation0 + $0x2] ss:$8 sm:$0xf0]  }
   0xc   :  { %v69_v14 = vld [vmem:[#allocation0 + $0x1] ss:$8 sm:$0xf0]   ;;  %v41_v17 = vld [vmem:[#allocation0] ss:$8 sm:$0xf0]  }
   0xd   :  { %v47_v10 = vld [vmem:[#allocation0 + $0x3] ss:$8 sm:$0xf]   ;;  %v57_v11 = vld [vmem:[#allocation0 + $0x2] ss:$8 sm:$0xf]  }
   0xe   :  { %v51_v12 = vsel %vm42_vm0, %v49_v8, %v47_v10  ;;  %v67_v13 = vld [vmem:[#allocation0 + $0x1] ss:$8 sm:$0xf]   ;;  %v40_v16 = vld [vmem:[#allocation0] ss:$8 sm:$0xf]   ;;  %v61_v18 = vsel %vm42_vm0, %v59_v9, %v57_v11 }
   0xf   :  { %52 = vrot.lane.b32.xlu0 %v51_v12, %s92_s0  ;;  %v71_v15 = vsel %vm42_vm0, %v69_v14, %v67_v13  ;;  %v43_v19 = vsel %vm42_vm0, %v41_v17, %v40_v16 }
  0x10   :  { %72 = vrot.lane.b32.xlu1 %v71_v15, %s93_s22  ;;  %45 = vst.msk [vmem:[%s147_s1] sm:$0xff] %vm44_vm1, %v43_v19  }
  0x13   :  { %62 = vrot.lane.b32.xlu0 %v61_v18, %s94_s25 }
  0x81   :  { %v53_v20 = vpop.permute.xlu0 %52  }
  0x82   :  { %55 = vst.msk [vmem:[%s147_s1] sm:$0xff] %vm54_vm2, %v53_v20   ;;  %v73_v21 = vpop.permute.xlu1 %72  }
  0x85   :  { %v63_v22 = vpop.permute.xlu0 %62  }
  0x86   :  { %65 = vst.msk [vmem:[%s147_s1] sm:$0xff] %vm64_vm3, %v63_v22  }
  0x87   :  { %75 = vst.msk [vmem:[%s147_s1] sm:$0xff] %vm74_vm4, %v73_v21  }

// kernel: llama_forward.1
= control target key start
LH: loop header
LB: loop body
LE: loop exit
PB: predicated region body
PF: predicated region fallthrough
CT: control target
= control target key end

     0   :  { %s2910_s0 = inlined_call_operand.vmem [shape: s32[8,1], index: 0, kind: input, shape index: {}]   ;;  %s2911_s1 = inlined_call_operand.vmem [shape: f32[8,64], index: 1, kind: input, shape index: {}]   ;;  %s2912_s2 = inlined_call_operand.vmem [shape: f32[8,64], index: 2, kind: input, shape index: {}]   ;;  %s2913_s3 = inlined_call_operand.vmem [shape: f32[8,32], index: 3, kind: input, shape index: {}]   ;;  %s2914_s4 = inlined_call_operand.vmem [shape: f32[8,32], index: 4, kind: input, shape index: {}]   ;;  %s2915_s5 = inlined_call_operand.vmem [shape: bf16[256,64], index: 5, kind: input, shape index: {}]   ;;  %s2916_s6 = inlined_call_operand.vmem [shape: bf16[64,256], index: 6, kind: input, shape index: {}]   ;;  %s2917_s7 = inlined_call_operand.vmem [shape: f32[1,64], index: 7, kind: input, shape index: {}]   ;;  %s2918_s8 = inlined_call_operand.vmem [shape: f32[1,64], index: 8, kind: input, shape index: {}]   ;;  %s2919_s9 = inlined_call_operand.vmem [shape: f32[1,64], index: 9, kind: input, shape index: {}]   ;;  %s2920_s10 = inlined_call_operand.vmem [shape: bf16[64,224], index: 10, kind: input, shape index: {}]   ;;  %s2921_s11 = inlined_call_operand.vmem [shape: bf16[64,64], index: 11, kind: input, shape index: {}]   ;;  %s2922_s12 = inlined_call_operand.vmem [shape: bf16[64,256], index: 12, kind: input, shape index: {}]   ;;  %s2923_s13 = inlined_call_operand.vmem [shape: bf16[128,64], index: 13, kind: input, shape index: {}]   ;;  %s2924_s14 = inlined_call_operand.vmem [shape: f32[1,64], index: 14, kind: input, shape index: {}]   ;;  %s2925_s15 = inlined_call_operand.vmem [shape: f32[1,64], index: 15, kind: input, shape index: {}]   ;;  %s2926_s16 = inlined_call_operand.vmem [shape: bf16[64,224], index: 16, kind: input, shape index: {}]   ;;  %s2927_s17 = inlined_call_operand.vmem [shape: bf16[64,64], index: 17, kind: input, shape index: {}]   ;;  %s2928_s18 = inlined_call_operand.vmem [shape: bf16[64,256], index: 18, kind: input, shape index: {}]   ;;  %s2929_s19 = inlined_call_operand.vmem [shape: bf16[128,64], index: 19, kind: input, shape index: {}]   ;;  %s2930_s20 = inlined_call_operand.hbm [shape: f32[1,256], index: 20, kind: output, shape index: {}]  }
   0x1   :  { %2931 = sst [smem:[#allocation5_spill]] %s2910_s0 }
   0x2   :  { %2932 = sst [smem:[#allocation6_spill]] %s2911_s1 }
   0x3   :  { %2933 = sst [smem:[#allocation7_spill]] %s2912_s2 }
   0x4   :  { %2934 = sst [smem:[#allocation8_spill]] %s2913_s3 }
   0x5   :  { %2935 = sst [smem:[#allocation9_spill]] %s2914_s4 }
   0x6   :  { %s2936_s23 = sld [smem:[#allocation5_spill]]  ;;  %v2293_v1 = vmov 0   ;;  %v2119_v2 = vld [vmem:[%s2915_s5 + $0x40] sm:$0xff]   ;;  %v2121_v4 = vld [vmem:[%s2915_s5 + $0x48] sm:$0xff]   ;;  %v2123_v6 = vld [vmem:[%s2915_s5 + $0x50] sm:$0xff]  }
   0x7   :  { %2118 = vset.pattern.permute.xlu0 %v2293_v1  ;;  %385 = vmatprep.mubr.bf16.mxu1 %v2293_v1  ;;  %v2120_v3 = vld [vmem:[%s2915_s5] sm:$0xff]   ;;  %v2122_v5 = vld [vmem:[%s2915_s5 + $0x8] sm:$0xff]   ;;  %v2124_v7 = vld [vmem:[%s2915_s5 + $0x10] sm:$0xff]  }
   0x8   :  { %1928 = vmatprep.subr.bf16.mxu0 %v2119_v2  ;;  %v2125_v8 = vld [vmem:[%s2915_s5 + $0x58] sm:$0xff]   ;;  %v2127_v10 = vld [vmem:[%s2915_s5 + $0x60] sm:$0xff]   ;;  %v2129_v12 = vld [vmem:[%s2915_s5 + $0x68] sm:$0xff]  }
   0x9   :  { %1929 = vmatpush3.bf16.msra.mxu0 %v2120_v3  ;;  %v2126_v9 = vld [vmem:[%s2915_s5 + $0x18] sm:$0xff]   ;;  %v2128_v11 = vld [vmem:[%s2915_s5 + $0x20] sm:$0xff]   ;;  %v2130_v13 = vld [vmem:[%s2915_s5 + $0x28] sm:$0xff]  }
   0xa   :  { %1930 = vmatprep.subr.bf16.mxu0 %v2121_v4  ;;  %v2131_v14 = vld [vmem:[%s2915_s5 + $0x70] sm:$0xff]   ;;  %v2133_v16 = vld [vmem:[%s2915_s5 + $0x78] sm:$0xff]  }
   0xb   :  { %v2132_v15 = vld [vmem:[%s2915_s5 + $0x30] sm:$0xff]   ;;  %v2134_v17 = vld [vmem:[%s2915_s5 + $0x38] sm:$0xff]  }
   0xc   :  { %v67_v0 = vld [vmem:[%s2936_s23] sm:$0xff] }
   0xd   :  { %72 = vperm.xlu0 %2118, %v67_v0   ;;  %1931 = vmatpush3.bf16.msra.mxu0 %v2122_v5 }
   0xe   :  { %1932 = vmatprep.subr.bf16.mxu0 %v2123_v6 }
  0x11   :  { %1933 = vmatpush3.bf16.msra.mxu0 %v2124_v7 }
  0x12   :  { %1934 = vmatprep.subr.bf16.mxu0 %v2125_v8 }
  0x15   :  { %1935 = vmatpush3.bf16.msra.mxu0 %v2126_v9 }
  0x16   :  { %1936 = vmatprep.subr.bf16.mxu0 %v2127_v10 }
  0x19   :  { %1937 = vmatpush3.bf16.msra.mxu0 %v2128_v11 }
  0x1a   :  { %1938 = vmatprep.subr.bf16.mxu0 %v2129_v12 }
  0x1d   :  { %1939 = vmatpush3.bf16.msra.mxu0 %v2130_v13 }
  0x1e   :  { %1940 = vmatprep.subr.bf16.mxu0 %v2131_v14 }
  0x21   :  { %1941 = vmatpush3.bf16.msra.mxu0 %v2132_v15 }
  0x22   :  { %1942 = vmatprep.subr.bf16.mxu0 %v2133_v16 }
  0x25   :  { %1943 = vmatpush3.bf16.msra.mxu0 %v2134_v17 }
  0x26   :  { %25 = vsyncpa [#allocation3], 0  ;;  %v68_v18 = vlaneseq  ;;  %v2294_v22 = vmov 1.0|1.0   ;;  %vm285_vm4 = vcmask 523264   ;;  %s2937_s3 = sld [smem:[#allocation8_spill]] }
  0x27   :  { %v2135_v30 = vld [vmem:[%s2920_s10 + $0x4] ss:$8 sps:$4 sm:$0xff]   ;;  %v2137_v31 = vld [vmem:[%s2920_s10] ss:$8 sps:$4 sm:$0xff]   ;;  %v2138_v32 = vld [vmem:[%s2920_s10 + $0x14] ss:$8 sps:$4 sm:$0xff]  }
  0x28   :  { %v2464_v19 = vand.u32 127, %v68_v18  ;;  %353 = vmatprep.subr.bf16.mxu1 %v2135_v30  ;;  %v2140_v33 = vld [vmem:[%s2920_s10 + $0x10] ss:$8 sps:$4 sm:$0xff]   ;;  %v2141_v34 = vld [vmem:[%s2920_s10 + $0x24] ss:$8 sps:$4 sm:$0xff]   ;;  %s2295_s26 = smov 64  }
  0x29   :  { %354 = vmatpush1.bf16.msra.mxu1 %v2137_v31  ;;  %v2143_v35 = vld [vmem:[%s2920_s10 + $0x20] ss:$8 sps:$4 sm:$0xff]   ;;  %v2144_v36 = vld [vmem:[%s2920_s10 + $0x34] ss:$8 sps:$4 sm:$0xff]   ;;  %v2146_v37 = vld [vmem:[%s2920_s10 + $0x30] ss:$8 sps:$4 sm:$0xff]  }
  0x2a   :  { %v70_v20 = vadd.s32 128, %v2464_v19  ;;  %355 = vmatprep.subr.bf16.mxu1 %v2138_v32  ;;  %s2938_s4 = sld [smem:[#allocation9_spill]]  ;;  %v1842_v44 = vld [vmem:[%s2918_s8] ss:$0 sm:$0xff]  ;;  %v2296_v49 = vmov 0.0   ;;  %s2939_s21 = sld [smem:[#allocation6_spill]] }
  0x2b   :  { %2018 = vmatprep.subr.bf16.mxu0 %v2296_v49  ;;  %s2940_s22 = sld [smem:[#allocation7_spill]]  ;;  %vm2297_vm5 = vmmov 0   ;;  %s2298_s23 = smov 112   ;;  %vm418_vm6 = vcmask 130048   ;;  %v2542_v5 = vshrl.u32 %v68_v18, 7  ;;  %vm468_vm8 = vcmask 64512  }
  0x2c   :  { %v252_v38 = vld [vmem:[%s2937_s3] sm:$0xff]  ;;  %s2299_s24 = smov 48   ;;  %s2300_s2 = smov 32   ;;  %vm498_vm10 = vcmask 1043456   ;;  %vm683_vm11 = vcmask 261120   ;;  %vm1671_vm12 = vcmask 523271  }
  0x2d   :  { %356 = vmatpush1.bf16.msra.mxu1 %v2140_v33  ;;  %398 = vrot.lane.b32.xlu1 %v252_v38, %s2295_s26  ;;  %v256_v6 = vadd.s32 8, %v2542_v5  ;;  %v261_v7 = vand.u32 7, %v2542_v5  ;;  %s2301_s5 = smov 96   ;;  %s2302_s25 = smov 16   ;;  %vm1803_vm13 = vcmp.lt.s32.totalorder %v68_v18, 256 }
  0x2e   :  { %357 = vmatprep.subr.bf16.mxu1 %v2141_v34 }
  0x2f   :  { %v268_v8 = vand.u32 7, %v256_v6  ;;  %vm2547_vm7 = vcmp.le.s32.totalorder %v2464_v19, %v261_v7 }
  0x30   :  { %v253_v39 = vld [vmem:[%s2938_s4] sm:$0xff] }
  0x31   :  { %358 = vmatpush1.bf16.msra.mxu1 %v2143_v35  ;;  %403 = vrot.lane.b32.xlu1 %v253_v39, %s2295_s26  ;;  %v2517_v50 = vld [vmem:[%s2939_s21] sm:$0xff]  ;;  %vm2552_vm9 = vcmp.le.s32.totalorder %v2464_v19, %v268_v8 }
  0x32   :  { %359 = vmatprep.subr.bf16.mxu1 %v2144_v36  ;;  %v2524_v52 = vld [vmem:[%s2940_s22] sm:$0xff] }
  0x35   :  { %360 = vmatpush1.bf16.msra.mxu1 %v2146_v37 }
  0x36   :  { %1994 = vmatprep.subr.bf16.mxu1 %v2296_v49 }
  0x8c   :  { %v73_v21 = vpop.permute.xlu0 %72 }
  0x8d   :  { %vm74_vm0 = vcmp.eq.s32.totalorder %v2464_v19, %v73_v21  ;;  %vm75_vm1 = vcmp.eq.s32.totalorder %v70_v20, %v73_v21 }
  0x8e   :  { %vm1840_vm2 = vmpackc.low %vm74_vm0, %vm74_vm0 }
  0x8f   :  { %vm1838_vm3 = vmpackc.low %vm75_vm1, %vm75_vm1 }
  0x90   :  { %1839 = vmatprep.mubr.msk.bf16.mxu0 %vm1838_vm3, %v2294_v22 }
  0x91   :  { %1841 = vmatmul.mubr.msk.bf16.vlgmr.msra.gmra.mrb[0].mxu0 %vm1840_vm2, %v2294_v22 }
  0x92   :  { %2026 = vmatprep.mubr.msk.bf16.mxu0 %vm2297_vm5, %v2296_v49 }
  0x9f   :  { %v2510_v48 = vpop.permute.xlu1 %398 }
  0xa3   :  { %v2519_v51 = vpop.permute.xlu1 %403 }
 0x164   :  { %v1944_v23 = vpop.f32.mrb[0].mxu0 }
 0x165   :  { %v1945_v24 = vpop.f32.mrb[1].mxu0 }
 0x166   :  { %v2468_v25 = vadd.f32 %v1945_v24, %v1944_v23  ;;  %v1947_v26 = vpop.f32.mrb[2].mxu0 }
 0x167   :  { %v1948_v27 = vpop.f32.mrb[3].mxu0 }
 0x168   :  { %v284_v28 = vmul.f32 %v2468_v25, %v2468_v25 }
 0x16a   :  { %v286_v29 = vsel %vm285_vm4, %v284_v28, 0.0 }
 0x16b   :  { %287 = vadd.xlane.f32.xlu0 %v286_v29 }
 0x1f8   :  { %v288_v40 = vpop.xlane.xlu0 %287 }
 0x1f9   :  { %v290_v41 = vmul.f32 0.015625, %v288_v40 }
 0x1fb   :  { %v291_v42 = vadd.f32 1e-06, %v290_v41 }
 0x1fd   :  { %2219 = vrsqrt.f32 %v291_v42 }
 0x207   :  { %v2220_v43 = vpop.eup %2219 }
 0x208   :  { %v293_v45 = vmul.f32 %v2220_v43, %v2468_v25 }
 0x20a   :  { %v300_v46 = vmul.f32 %v1842_v44, %v293_v45 }
 0x20c   :  { %v301_v47 = vpack.c.bf16 %v300_v46, %v300_v46 }
 0x20e   :  { %1851 = vmatmul.mubr.msk.bf16.vlgmr.msra.gmra.mrb[0].mxu1 %vm285_vm4, %v301_v47 }
 0x20f   :  { %1996 = vmatprep.mubr.msk.bf16.mxu1 %vm2297_vm5, %v2296_v49 }
 0x2e1   :  { %v387_v53 = vpop.f32.mrb[0].mxu1 }
 0x2e2   :  { %v394_v54 = vmul.f32 %v387_v53, %v2517_v50  ;;  %v401_v55 = vmul.f32 %v2510_v48, %v387_v53  ;;  %v389_v56 = vpop.f32.mrb[1].mxu1  ;;  %v414_v31 = vpack.c.bf16 %v387_v53, %v387_v53 }
 0x2e3   :  { %v395_v57 = vmul.f32 %v389_v56, %v2524_v52  ;;  %v406_v58 = vmul.f32 %v2519_v51, %v389_v56  ;;  %v391_v59 = vpop.f32.mrb[2].mxu1 }
 0x2e4   :  { %v392_v60 = vpop.f32.mrb[3].mxu1 }
 0x2e5   :  { %v396_v61 = vadd.f32 %v395_v57, %v394_v54  ;;  %v407_v62 = vadd.f32 %v406_v58, %v401_v55 }
 0x2e7   :  { %v413_v63 = vpack.c.bf16 %v407_v62, %v407_v62 }
 0x2e9   :  { %416 = vrot.lane.b32.xlu1 %v413_v63, %s2295_s26 }
 0x2ed   :  { %409 = vrot.lane.b32.xlu1 %v396_v61, %s2298_s23 }
 0x35b   :  { %v417_v0 = vpop.permute.xlu1 %416 }
 0x35c   :  { %v423_v2 = vsel %vm418_vm6, %v417_v0, 0 }
 0x35d   :  { %1995 = vmatpush3.bf16.xpose.msra.mxu1 %v423_v2 }
 0x35e   :  { %2000 = vmatprep.subr.bf16.mxu1 %v2296_v49 }
 0x35f   :  { %v410_v3 = vpop.permute.xlu1 %409 }
 0x360   :  { %v412_v4 = vpack.c.bf16 %v410_v3, %v396_v61 }
 0x364   :  { %1997 = vmatmul.mubr.msk.bf16.vlgmr.msra.gmra.mrb[4].mxu1 %vm418_vm6, %v412_v4 }
 0x365   :  { %2002 = vmatprep.mubr.msk.bf16.mxu1 %vm2297_vm5, %v2296_v49 }
 0x437   :  { %v459_v10 = vpop.f32.mrb[4].mxu1 }
 0x438   :  { %v466_v12 = vsel %vm2547_vm7, %v459_v10, -1e+30  ;;  %v1998_v13 = vpop.f32.mrb[5].mxu1 }
 0x439   :  { %v462_v14 = vpop.f32.mrb[6].mxu1  ;;  %v469_v15 = vsel %vm468_vm8, %v466_v12, -inf }
 0x43a   :  { %v467_v16 = vsel %vm2552_vm9, %v462_v14, -1e+30  ;;  %470 = vmax.xlane.f32.xlu1 %v469_v15  ;;  %v1999_v17 = vpop.f32.mrb[7].mxu1 }
 0x43b   :  { %v472_v20 = vsel %vm468_vm8, %v467_v16, -inf }
 0x43c   :  { %473 = vmax.xlane.f32.xlu0 %v472_v20 }
 0x44b   :  { %551 = vrot.lane.b32.xlu1 %v413_v63, %s2299_s24 }
 0x4c7   :  { %v471_v19 = vpop.xlane.xlu1 %470 }
 0x4c8   :  { %v475_v21 = vsub.f32 %v466_v12, %v471_v19 }
 0x4c9   :  { %v474_v22 = vpop.xlane.xlu0 %473 }
 0x4ca   :  { %v477_v23 = vmul.f32 1.442695, %v475_v21  ;;  %v476_v24 = vsub.f32 %v467_v16, %v474_v22  ;;  %v2147_v21 = vld [vmem:[%s2921_s11] sm:$0xff]   ;;  %v2148_v22 = vld [vmem:[%s2921_s11 + $0x8] sm:$0xff]  }
 0x4cb   :  { %v552_v40 = vpop.permute.xlu1 %551  ;;  %2019 = vmatpush3.bf16.msra.mxu0 %v2147_v21 }
 0x4cc   :  { %2221 = vpow2.f32 %v477_v23  ;;  %v479_v26 = vmul.f32 1.442695, %v476_v24  ;;  %v557_v42 = vsel %vm418_vm6, %v552_v40, 0  ;;  %2020 = vmatprep.subr.bf16.mxu0 %v2296_v49  ;;  %v2149_v24 = vld [vmem:[%s2921_s11 + $0x10] sm:$0xff]  }
 0x4ce   :  { %2223 = vpow2.f32 %v479_v26 }
 0x4cf   :  { %2021 = vmatpush3.bf16.msra.mxu0 %v2148_v22 }
 0x4d0   :  { %2022 = vmatprep.subr.bf16.mxu0 %v2296_v49 }
 0x4d3   :  { %2023 = vmatpush3.bf16.msra.mxu0 %v2149_v24 }
 0x4d4   :  { %2024 = vmatprep.subr.bf16.mxu0 %v2296_v49 }
 0x4d6   :  { %v2222_v27 = vpop.eup %2221 }
 0x4d7   :  { %v481_v28 = vsel %vm468_vm8, %v2222_v27, 0.0 }
 0x4d8   :  { %v2224_v29 = vpop.eup %2223  ;;  %482 = vadd.xlane.f32.xlu0 %v481_v28 }
 0x4d9   :  { %v484_v30 = vsel %vm468_vm8, %v2224_v29, 0.0 }
 0x4dc   :  { %485 = vadd.xlane.f32.xlu0 %v484_v30 }
 0x4f2   :  { %493 = vrot.lane.b32.xlu0 %v414_v31, %s2300_s2 }
 0x4f6   :  { %549 = vrot.lane.b32.xlu0 %v412_v4, %s2301_s5 }
 0x565   :  { %v483_v32 = vpop.xlane.xlu0 %482 }
 0x566   :  { %2225 = vrcp.f32 %v483_v32 }
 0x569   :  { %v486_v33 = vpop.xlane.xlu0 %485 }
 0x56a   :  { %2227 = vrcp.f32 %v486_v33 }
 0x56d   :  { %v494_v34 = vpop.permute.xlu0 %493 }
 0x56e   :  { %v500_v35 = vsel %vm498_vm10, %v494_v34, 0 }
 0x56f   :  { %2001 = vmatpush3.bf16.msra.mxu1 %v500_v35 }
 0x570   :  { %2006 = vmatprep.subr.bf16.mxu1 %v2296_v49  ;;  %v2226_v36 = vpop.eup %2225 }
 0x571   :  { %v489_v38 = vmul.f32 %v2226_v36, %v2222_v27  ;;  %v550_v43 = vpop.permute.xlu0 %549 }
 0x574   :  { %v2228_v37 = vpop.eup %2227 }
 0x575   :  { %v490_v39 = vmul.f32 %v2228_v37, %v2224_v29  ;;  %v2150_v29 = vld [vmem:[%s2921_s11 + $0x18] sm:$0xff]  }
 0x576   :  { %2025 = vmatpush3.bf16.msra.mxu0 %v2150_v29 }
 0x577   :  { %v491_v41 = vpack.c.bf16 %v490_v39, %v489_v38  ;;  %2030 = vmatprep.subr.bf16.mxu0 %v2296_v49 }
 0x579   :  { %2003 = vmatmul.mubr.msk.bf16.vlgmr.msra.gmra.mrb[8].mxu1 %vm468_vm8, %v491_v41 }
 0x57a   :  { %2007 = vmatpush3.bf16.xpose.msra.mxu1 %v557_v42  ;;  %2008 = vmatprep.mubr.msk.bf16.mxu1 %vm2297_vm5, %v2296_v49 }
 0x57b   :  { %2012 = vmatprep.subr.bf16.mxu1 %v2296_v49 }
 0x581   :  { %2009 = vmatmul.mubr.msk.bf16.vlgmr.msra.gmra.mrb[12].mxu1 %vm418_vm6, %v550_v43 }
 0x582   :  { %2014 = vmatprep.mubr.msk.bf16.mxu1 %vm2297_vm5, %v2296_v49 }
 0x64c   :  { %v2577_v44 = vpop.f32.mrb[8].mxu1 }
 0x64d   :  { %v2004_v45 = vpop.f32.mrb[9].mxu1 }
 0x64e   :  { %v539_v46 = vpop.f32.mrb[10].mxu1  ;;  %v2151_v45 = vld [vmem:[%s2922_s12] ss:$8 sps:$4 sm:$0xff]  }
 0x64f   :  { %v2005_v47 = vpop.f32.mrb[11].mxu1 }
 0x650   :  { %v2159_v47 = vld [vmem:[%s2922_s12 + $0x24] ss:$8 sps:$4 sm:$0xff]  }
 0x654   :  { %v593_v53 = vpop.f32.mrb[12].mxu1 }
 0x655   :  { %v600_v54 = vsel %vm2547_vm7, %v593_v53, -1e+30  ;;  %v2010_v55 = vpop.f32.mrb[13].mxu1  ;;  %v2157_v53 = vld [vmem:[%s2922_s12 + $0x20] ss:$8 sps:$4 sm:$0xff]  }
 0x656   :  { %v596_v56 = vpop.f32.mrb[14].mxu1  ;;  %v602_v57 = vsel %vm468_vm8, %v600_v54, -inf  ;;  %v2162_v55 = vld [vmem:[%s2922_s12 + $0x34] ss:$8 sps:$4 sm:$0xff]  }
 0x657   :  { %v601_v58 = vsel %vm2552_vm9, %v596_v56, -1e+30  ;;  %603 = vmax.xlane.f32.xlu1 %v602_v57  ;;  %v2011_v59 = vpop.f32.mrb[15].mxu1 }
 0x658   :  { %v605_v60 = vsel %vm468_vm8, %v601_v58, -inf }
 0x659   :  { %606 = vmax.xlane.f32.xlu0 %v605_v60  ;;  %v1861_v60 = vld [vmem:[%s2919_s9] ss:$0 sm:$0xff] }
 0x6e4   :  { %v604_v61 = vpop.xlane.xlu1 %603 }
 0x6e5   :  { %v608_v62 = vsub.f32 %v600_v54, %v604_v61  ;;  %v2160_v54 = vld [vmem:[%s2922_s12 + $0x30] ss:$8 sps:$4 sm:$0xff]  }
 0x6e6   :  { %v607_v63 = vpop.xlane.xlu0 %606 }
 0x6e7   :  { %v610_v0 = vmul.f32 1.442695, %v608_v62  ;;  %v609_v2 = vsub.f32 %v601_v58, %v607_v63 }
 0x6e9   :  { %2229 = vpow2.f32 %v610_v0  ;;  %v612_v3 = vmul.f32 1.442695, %v609_v2  ;;  %v2163_v0 = vld [vmem:[%s2923_s13] sm:$0xff]   ;;  %v2164_v2 = vld [vmem:[%s2923_s13 + $0x8] sm:$0xff]  }
 0x6eb   :  { %2231 = vpow2.f32 %v612_v3  ;;  %v2165_v3 = vld [vmem:[%s2923_s13 + $0x10] sm:$0xff]  }
 0x6f3   :  { %v2230_v4 = vpop.eup %2229 }
 0x6f4   :  { %v614_v6 = vsel %vm468_vm8, %v2230_v4, 0.0 }
 0x6f5   :  { %v2232_v7 = vpop.eup %2231  ;;  %615 = vadd.xlane.f32.xlu0 %v614_v6  ;;  %v2167_v6 = vld [vmem:[%s2923_s13 + $0x20] sm:$0xff]  }
 0x6f6   :  { %v617_v8 = vsel %vm468_vm8, %v2232_v7, 0.0 }
 0x6f7   :  { %618 = vadd.xlane.f32.xlu1 %v617_v8  ;;  %v2169_v8 = vld [vmem:[%s2923_s13 + $0x30] sm:$0xff]  }
 0x70b   :  { %625 = vrot.lane.b32.xlu0 %v414_v31, %s2302_s25 }
 0x782   :  { %v616_v10 = vpop.xlane.xlu0 %615 }
 0x783   :  { %2233 = vrcp.f32 %v616_v10  ;;  %v2170_v10 = vld [vmem:[%s2923_s13 + $0x38] sm:$0xff]  }
 0x784   :  { %v619_v12 = vpop.xlane.xlu1 %618 }
 0x785   :  { %2235 = vrcp.f32 %v619_v12 }
 0x786   :  { %v626_v13 = vpop.permute.xlu0 %625 }
 0x787   :  { %v631_v14 = vsel %vm498_vm10, %v626_v13, 0 }
 0x788   :  { %2013 = vmatpush3.bf16.msra.mxu1 %v631_v14 }
 0x78d   :  { %v2234_v15 = vpop.eup %2233 }
 0x78e   :  { %v622_v17 = vmul.f32 %v2234_v15, %v2230_v4  ;;  %v2166_v4 = vld [vmem:[%s2923_s13 + $0x18] sm:$0xff]  }
 0x78f   :  { %v2236_v16 = vpop.eup %2235 }
 0x790   :  { %v623_v20 = vmul.f32 %v2236_v16, %v2232_v7  ;;  %v2168_v7 = vld [vmem:[%s2923_s13 + $0x28] sm:$0xff]  }
 0x792   :  { %v624_v19 = vpack.c.bf16 %v623_v20, %v622_v17 }
 0x794   :  { %2015 = vmatmul.mubr.msk.bf16.vlgmr.msra.gmra.mrb[16].mxu1 %vm468_vm8, %v624_v19 }
 0x795   :  { %861 = vmatprep.mubr.bf16.mxu1 %v2293_v1 }
 0x867   :  { %v667_v23 = vpop.f32.mrb[16].mxu1 }
 0x868   :  { %v2016_v26 = vpop.f32.mrb[17].mxu1 }
 0x869   :  { %v670_v27 = vpop.f32.mrb[18].mxu1 }
 0x86a   :  { %675 = vrot.lane.b32.xlu1 %v670_v27, %s2302_s25  ;;  %v2017_v28 = vpop.f32.mrb[19].mxu1 }
 0x86e   :  { %544 = vrot.lane.b32.xlu1 %v539_v46, %s2302_s25  ;;  %v2154_v46 = vld [vmem:[%s2922_s12 + $0x10] ss:$8 sps:$4 sm:$0xff]  }
 0x8dc   :  { %v676_v30 = vpop.permute.xlu1 %675 }
 0x8dd   :  { %v678_v31 = vsel %vm418_vm6, %v667_v23, %v676_v30 }
 0x8de   :  { %680 = vrot.lane.b32.xlu0 %v678_v31, %s2300_s2 }
 0x8e0   :  { %v545_v32 = vpop.permute.xlu1 %544 }
 0x8e1   :  { %v547_v33 = vsel %vm418_vm6, %v2577_v44, %v545_v32  ;;  %v2153_v44 = vld [vmem:[%s2922_s12 + $0x4] ss:$8 sps:$4 sm:$0xff]  }
 0x8e2   :  { %829 = vmatprep.subr.bf16.mxu1 %v2153_v44  ;;  %v2173_v32 = vld [vmem:[%s2926_s16 + $0x4] ss:$8 sps:$4 sm:$0xff]   ;;  %v1880_v44 = vld [vmem:[%s2924_s14] ss:$0 sm:$0xff] }
 0x8e3   :  { %830 = vmatpush1.bf16.msra.mxu1 %v2151_v45 }
 0x950   :  { %v681_v34 = vpop.permute.xlu0 %680 }
 0x951   :  { %v684_v35 = vsel %vm683_vm11, %v547_v33, %v681_v34  ;;  %v2171_v33 = vld [vmem:[%s2926_s16] ss:$8 sps:$4 sm:$0xff]   ;;  %v2176_v34 = vld [vmem:[%s2926_s16 + $0x14] ss:$8 sps:$4 sm:$0xff]  }
 0x952   :  { %v685_v36 = vpack.c.bf16 %v684_v35, %v684_v35  ;;  %v2174_v35 = vld [vmem:[%s2926_s16 + $0x10] ss:$8 sps:$4 sm:$0xff]  }
 0x954   :  { %2027 = vmatmul.mubr.msk.bf16.vlgmr.msra.gmra.mrb[4].mxu0 %vm285_vm4, %v685_v36  ;;  %v2179_v36 = vld [vmem:[%s2926_s16 + $0x24] ss:$8 sps:$4 sm:$0xff]  }
 0x955   :  { %2046 = vmatprep.mubr.msk.bf16.mxu0 %vm2297_vm5, %v2296_v49  ;;  %2031 = vmatpush3.bf16.msra.mxu0 %v2163_v0 }
 0x956   :  { %2032 = vmatprep.subr.bf16.mxu0 %v2296_v49 }
 0x959   :  { %2033 = vmatpush3.bf16.msra.mxu0 %v2164_v2 }
 0x95a   :  { %2034 = vmatprep.subr.bf16.mxu0 %v2296_v49 }
 0x95d   :  { %2035 = vmatpush3.bf16.msra.mxu0 %v2165_v3 }
 0x95e   :  { %2036 = vmatprep.subr.bf16.mxu0 %v2296_v49 }
 0x961   :  { %2037 = vmatpush3.bf16.msra.mxu0 %v2166_v4 }
 0x962   :  { %2038 = vmatprep.subr.bf16.mxu0 %v2296_v49 }
 0x965   :  { %2039 = vmatpush3.bf16.msra.mxu0 %v2167_v6 }
 0x966   :  { %2040 = vmatprep.subr.bf16.mxu0 %v2296_v49 }
 0x969   :  { %2041 = vmatpush3.bf16.msra.mxu0 %v2168_v7 }
 0x96a   :  { %2042 = vmatprep.subr.bf16.mxu0 %v2296_v49 }
 0x96d   :  { %2043 = vmatpush3.bf16.msra.mxu0 %v2169_v8 }
 0x96e   :  { %2044 = vmatprep.subr.bf16.mxu0 %v2296_v49 }
 0x971   :  { %2045 = vmatpush3.bf16.msra.mxu0 %v2170_v10 }
 0x972   :  { %2062 = vmatprep.subr.bf16.mxu0 %v2296_v49 }
 0xa27   :  { %v755_v37 = vpop.f32.mrb[4].mxu0 }
 0xa28   :  { %v2618_v38 = vadd.f32 %v2468_v25, %v755_v37  ;;  %v2028_v39 = vpop.f32.mrb[5].mxu0  ;;  %v2156_v25 = vld [vmem:[%s2922_s12 + $0x14] ss:$8 sps:$4 sm:$0xff]   ;;  %v2177_v37 = vld [vmem:[%s2926_s16 + $0x20] ss:$8 sps:$4 sm:$0xff]  }
 0xa29   :  { %v758_v40 = vpop.f32.mrb[6].mxu0  ;;  %831 = vmatprep.subr.bf16.mxu1 %v2156_v25  ;;  %v2182_v39 = vld [vmem:[%s2926_s16 + $0x34] ss:$8 sps:$4 sm:$0xff]  }
 0xa2a   :  { %v2029_v41 = vpop.f32.mrb[7].mxu0  ;;  %v762_v42 = vmul.f32 %v2618_v38, %v2618_v38  ;;  %832 = vmatpush1.bf16.msra.mxu1 %v2154_v46 }
 0xa2b   :  { %833 = vmatprep.subr.bf16.mxu1 %v2159_v47 }
 0xa2c   :  { %v763_v43 = vsel %vm285_vm4, %v762_v42, 0.0 }
 0xa2d   :  { %764 = vadd.xlane.f32.xlu1 %v763_v43 }
 0xa2e   :  { %834 = vmatpush1.bf16.msra.mxu1 %v2157_v53 }
 0xa2f   :  { %835 = vmatprep.subr.bf16.mxu1 %v2162_v55 }
 0xa32   :  { %836 = vmatpush1.bf16.msra.mxu1 %v2160_v54 }
 0xa33   :  { %1051 = vmatprep.subr.bf16.mxu1 %v2173_v32 }
 0xaba   :  { %v765_v56 = vpop.xlane.xlu1 %764 }
 0xabb   :  { %v766_v57 = vmul.f32 0.015625, %v765_v56 }
 0xabd   :  { %v767_v58 = vadd.f32 1e-06, %v766_v57 }
 0xabf   :  { %2237 = vrsqrt.f32 %v767_v58 }
 0xac9   :  { %v2238_v59 = vpop.eup %2237 }
 0xaca   :  { %v769_v61 = vmul.f32 %v2238_v59, %v2618_v38 }
 0xacc   :  { %v776_v62 = vmul.f32 %v1861_v60, %v769_v61 }
 0xace   :  { %v777_v63 = vpack.c.bf16 %v776_v62, %v776_v62 }
 0xad0   :  { %1870 = vmatmul.mubr.msk.bf16.vlgmr.msra.gmra.mrb[20].mxu1 %vm285_vm4, %v777_v63 }
 0xad1   :  { %1083 = vmatprep.mubr.bf16.mxu1 %v2293_v1  ;;  %1052 = vmatpush1.bf16.msra.mxu1 %v2171_v33 }
 0xad2   :  { %1053 = vmatprep.subr.bf16.mxu1 %v2176_v34 }
 0xad5   :  { %1054 = vmatpush1.bf16.msra.mxu1 %v2174_v35 }
 0xad6   :  { %1055 = vmatprep.subr.bf16.mxu1 %v2179_v36 }
 0xad9   :  { %1056 = vmatpush1.bf16.msra.mxu1 %v2177_v37 }
 0xada   :  { %1057 = vmatprep.subr.bf16.mxu1 %v2182_v39 }
 0xba3   :  { %v863_v12 = vpop.f32.mrb[20].mxu1 }
 0xba4   :  { %v1871_v13 = vmul.f32 -1.442695, %v863_v12  ;;  %v865_v14 = vpop.f32.mrb[21].mxu1 }
 0xba5   :  { %v867_v15 = vpop.f32.mrb[22].mxu1 }
 0xba6   :  { %2239 = vpow2.f32 %v1871_v13  ;;  %v868_v16 = vpop.f32.mrb[23].mxu1 }
 0xbb0   :  { %v2240_v17 = vpop.eup %2239 }
 0xbb1   :  { %v873_v20 = vadd.f32 1.0, %v2240_v17 }
 0xbb3   :  { %2241 = vrcp.f32 %v873_v20 }
 0xbbd   :  { %v2242_v19 = vpop.eup %2241 }
 0xbbe   :  { %v876_v21 = vmul.f32 %v2242_v19, %v863_v12 }
 0xbc0   :  { %v877_v22 = vmul.f32 %v876_v21, %v865_v14 }
 0xbc2   :  { %v878_v23 = vpack.c.bf16 %v877_v22, %v877_v22 }
 0xbc4   :  { %2047 = vmatmul.mubr.bf16.vlgmr.msra.gmra.mrb[8].mxu0 %v878_v23 }
 0xbc5   :  { %2064 = vmatprep.mubr.msk.bf16.mxu0 %vm2297_vm5, %v2296_v49 }
 0xc97   :  { %v977_v24 = vpop.f32.mrb[8].mxu0 }
 0xc98   :  { %v2688_v26 = vadd.f32 %v977_v24, %v2618_v38  ;;  %v2048_v27 = vpop.f32.mrb[9].mxu0  ;;  %v2180_v38 = vld [vmem:[%s2926_s16 + $0x30] ss:$8 sps:$4 sm:$0xff]  }
 0xc99   :  { %v980_v28 = vpop.f32.mrb[10].mxu0  ;;  %1058 = vmatpush1.bf16.msra.mxu1 %v2180_v38 }
 0xc9a   :  { %v2049_v29 = vpop.f32.mrb[11].mxu0  ;;  %v984_v30 = vmul.f32 %v2688_v26, %v2688_v26  ;;  %2050 = vmatprep.subr.bf16.mxu1 %v2296_v49 }
 0xc9c   :  { %v985_v31 = vsel %vm285_vm4, %v984_v30, 0.0 }
 0xc9d   :  { %986 = vadd.xlane.f32.xlu0 %v985_v31 }
 0xd2a   :  { %v987_v40 = vpop.xlane.xlu0 %986 }
 0xd2b   :  { %v988_v41 = vmul.f32 0.015625, %v987_v40 }
 0xd2d   :  { %v989_v42 = vadd.f32 1e-06, %v988_v41 }
 0xd2f   :  { %2243 = vrsqrt.f32 %v989_v42 }
 0xd39   :  { %v2244_v43 = vpop.eup %2243 }
 0xd3a   :  { %v991_v45 = vmul.f32 %v2244_v43, %v2688_v26 }
 0xd3c   :  { %v998_v25 = vmul.f32 %v1880_v44, %v991_v45 }
 0xd3e   :  { %v999_v46 = vpack.c.bf16 %v998_v25, %v998_v25 }
 0xd40   :  { %1889 = vmatmul.mubr.msk.bf16.vlgmr.msra.gmra.mrb[24].mxu1 %vm285_vm4, %v999_v46 }
 0xd41   :  { %2052 = vmatprep.mubr.msk.bf16.mxu1 %vm2297_vm5, %v2296_v49 }
 0xe13   :  { %v2725_v47 = vpop.f32.mrb[24].mxu1 }
 0xe14   :  { %v1092_v53 = vmul.f32 %v2725_v47, %v2517_v50  ;;  %v1095_v54 = vmul.f32 %v2725_v47, %v2510_v48  ;;  %v1087_v55 = vpop.f32.mrb[25].mxu1  ;;  %v1104_v43 = vpack.c.bf16 %v2725_v47, %v2725_v47 }
 0xe15   :  { %v1093_v56 = vmul.f32 %v1087_v55, %v2524_v52  ;;  %v1096_v57 = vmul.f32 %v1087_v55, %v2519_v51  ;;  %v1089_v58 = vpop.f32.mrb[26].mxu1 }
 0xe16   :  { %v1090_v59 = vpop.f32.mrb[27].mxu1 }
 0xe17   :  { %v1094_v60 = vadd.f32 %v1093_v56, %v1092_v53  ;;  %v1097_v61 = vadd.f32 %v1096_v57, %v1095_v54 }
 0xe19   :  { %1099 = vrot.lane.b32.xlu0 %v1094_v60, %s2298_s23  ;;  %v1103_v62 = vpack.c.bf16 %v1097_v61, %v1097_v61 }
 0xe1b   :  { %1106 = vrot.lane.b32.xlu1 %v1103_v62, %s2295_s26 }
 0xe1f   :  { %1238 = vrot.lane.b32.xlu1 %v1103_v62, %s2299_s24 }
 0xe8b   :  { %v1100_v50 = vpop.permute.xlu0 %1099 }
 0xe8c   :  { %v1102_v63 = vpack.c.bf16 %v1100_v50, %v1094_v60 }
 0xe8d   :  { %v1107_v0 = vpop.permute.xlu1 %1106 }
 0xe8e   :  { %v1112_v48 = vsel %vm418_vm6, %v1107_v0, 0  ;;  %1236 = vrot.lane.b32.xlu0 %v1102_v63, %s2301_s5 }
 0xe8f   :  { %2051 = vmatpush3.bf16.xpose.msra.mxu1 %v1112_v48 }
 0xe90   :  { %2056 = vmatprep.subr.bf16.mxu1 %v2296_v49 }
 0xe91   :  { %v1239_v51 = vpop.permute.xlu1 %1238 }
 0xe92   :  { %v1244_v52 = vsel %vm418_vm6, %v1239_v51, 0  ;;  %v2183_v51 = vld [vmem:[%s2927_s17] sm:$0xff]  }
 0xe93   :  { %2063 = vmatpush3.bf16.xpose.msra.mxu0 %v1244_v52 }
 0xe94   :  { %2074 = vmatprep.subr.bf16.mxu0 %v2296_v49 }
 0xe96   :  { %2053 = vmatmul.mubr.msk.bf16.vlgmr.msra.gmra.mrb[28].mxu1 %vm418_vm6, %v1102_v63 }
 0xe97   :  { %2058 = vmatprep.mubr.msk.bf16.mxu1 %vm2297_vm5, %v2296_v49 }
 0xf00   :  { %v1237_v2 = vpop.permute.xlu0 %1236 }
 0xf01   :  { %2065 = vmatmul.mubr.msk.bf16.vlgmr.msra.gmra.mrb[12].mxu0 %vm418_vm6, %v1237_v2 }
 0xf02   :  { %2082 = vmatprep.mubr.msk.bf16.mxu0 %vm2297_vm5, %v2296_v49  ;;  %2075 = vmatpush3.bf16.msra.mxu0 %v2183_v51 }
 0xf03   :  { %2076 = vmatprep.subr.bf16.mxu0 %v2296_v49 }
 0xf69   :  { %v1148_v3 = vpop.f32.mrb[28].mxu1 }
 0xf6a   :  { %v1155_v4 = vsel %vm2547_vm7, %v1148_v3, -1e+30  ;;  %v2054_v6 = vpop.f32.mrb[29].mxu1  ;;  %v2184_v3 = vld [vmem:[%s2927_s17 + $0x8] sm:$0xff]  }
 0xf6b   :  { %v1151_v7 = vpop.f32.mrb[30].mxu1  ;;  %v1157_v8 = vsel %vm468_vm8, %v1155_v4, -inf  ;;  %2077 = vmatpush3.bf16.msra.mxu0 %v2184_v3  ;;  %v2185_v6 = vld [vmem:[%s2927_s17 + $0x10] sm:$0xff]  }
 0xf6c   :  { %v1156_v10 = vsel %vm2552_vm9, %v1151_v7, -1e+30  ;;  %1158 = vmax.xlane.f32.xlu1 %v1157_v8  ;;  %v2055_v12 = vpop.f32.mrb[31].mxu1  ;;  %2078 = vmatprep.subr.bf16.mxu0 %v2296_v49 }
 0xf6d   :  { %v1160_v13 = vsel %vm468_vm8, %v1156_v10, -inf }
 0xf6e   :  { %1161 = vmax.xlane.f32.xlu0 %v1160_v13  ;;  %v2186_v13 = vld [vmem:[%s2927_s17 + $0x18] sm:$0xff]  }
 0xf6f   :  { %2079 = vmatpush3.bf16.msra.mxu0 %v2185_v6  ;;  %v2209_v6 = vld [vmem:[%s2916_s6 + $0x4] ss:$8 sps:$4 sm:$0xff]  }
 0xf70   :  { %2080 = vmatprep.subr.bf16.mxu0 %v2296_v49 }
 0xf73   :  { %2081 = vmatpush3.bf16.msra.mxu0 %v2186_v13  ;;  %v2215_v13 = vld [vmem:[%s2916_s6 + $0x24] ss:$8 sps:$4 sm:$0xff]  }
 0xf74   :  { %2086 = vmatprep.subr.bf16.mxu0 %v2296_v49 }
 0xfd4   :  { %v1280_v14 = vpop.f32.mrb[12].mxu0 }
 0xfd5   :  { %v1287_v15 = vsel %vm2547_vm7, %v1280_v14, -1e+30  ;;  %v2066_v16 = vpop.f32.mrb[13].mxu0 }
 0xfd6   :  { %v1283_v17 = vpop.f32.mrb[14].mxu0  ;;  %v1289_v20 = vsel %vm468_vm8, %v1287_v15, -inf }
 0xfd7   :  { %v1288_v19 = vsel %vm2552_vm9, %v1283_v17, -1e+30  ;;  %v2067_v21 = vpop.f32.mrb[15].mxu0  ;;  %1290 = vmax.xlane.f32.xlu0 %v1289_v20 }
 0xfd8   :  { %v1292_v22 = vsel %vm468_vm8, %v1288_v19, -inf }
 0xfd9   :  { %1293 = vmax.xlane.f32.xlu1 %v1292_v22 }
 0xff9   :  { %v1159_v23 = vpop.xlane.xlu1 %1158 }
 0xffa   :  { %v1163_v24 = vsub.f32 %v1155_v4, %v1159_v23 }
 0xffb   :  { %v1162_v27 = vpop.xlane.xlu0 %1161 }
 0xffc   :  { %v1165_v28 = vmul.f32 1.442695, %v1163_v24  ;;  %v1164_v29 = vsub.f32 %v1156_v10, %v1162_v27 }
 0xffe   :  { %2245 = vpow2.f32 %v1165_v28  ;;  %v1167_v9 = vmul.f32 1.442695, %v1164_v29 }
0x1000   :  { %2247 = vpow2.f32 %v1167_v9 }
0x1008   :  { %v2246_v30 = vpop.eup %2245 }
0x1009   :  { %v1169_v31 = vsel %vm468_vm8, %v2246_v30, 0.0 }
0x100a   :  { %v2248_v32 = vpop.eup %2247  ;;  %1170 = vadd.xlane.f32.xlu0 %v1169_v31  ;;  %v2187_v31 = vld [vmem:[%s2928_s18] ss:$8 sps:$4 sm:$0xff]  }
0x100b   :  { %v1172_v11 = vsel %vm468_vm8, %v2248_v32, 0.0 }
0x100c   :  { %1173 = vadd.xlane.f32.xlu1 %v1172_v11  ;;  %v2195_v11 = vld [vmem:[%s2928_s18 + $0x24] ss:$8 sps:$4 sm:$0xff]  }
0x1064   :  { %v1291_v33 = vpop.xlane.xlu0 %1290 }
0x1065   :  { %v1295_v34 = vsub.f32 %v1287_v15, %v1291_v33  ;;  %v2193_v33 = vld [vmem:[%s2928_s18 + $0x20] ss:$8 sps:$4 sm:$0xff]  }
0x1066   :  { %v1294_v35 = vpop.xlane.xlu1 %1293 }
0x1067   :  { %v1297_v36 = vmul.f32 1.442695, %v1295_v34  ;;  %v1296_v37 = vsub.f32 %v1288_v19, %v1294_v35  ;;  %v2196_v34 = vld [vmem:[%s2928_s18 + $0x30] ss:$8 sps:$4 sm:$0xff]   ;;  %v2198_v35 = vld [vmem:[%s2928_s18 + $0x34] ss:$8 sps:$4 sm:$0xff]  }
0x1069   :  { %2249 = vpow2.f32 %v1297_v36  ;;  %v1299_v38 = vmul.f32 1.442695, %v1296_v37 }
0x106b   :  { %2251 = vpow2.f32 %v1299_v38 }
0x1073   :  { %v2250_v39 = vpop.eup %2249 }
0x1074   :  { %v1301_v40 = vsel %vm468_vm8, %v2250_v39, 0.0 }
0x1075   :  { %v2252_v41 = vpop.eup %2251  ;;  %1302 = vadd.xlane.f32.xlu0 %v1301_v40  ;;  %v1899_v40 = vld [vmem:[%s2925_s15] ss:$0 sm:$0xff] }
0x1076   :  { %v1304_v42 = vsel %vm468_vm8, %v2252_v41, 0.0 }
0x1077   :  { %1305 = vadd.xlane.f32.xlu1 %v1304_v42 }
0x1088   :  { %1312 = vrot.lane.b32.xlu1 %v1104_v43, %s2302_s25 }
0x108b   :  { %1181 = vrot.lane.b32.xlu0 %v1104_v43, %s2300_s2 }
0x1097   :  { %v1171_v45 = vpop.xlane.xlu0 %1170 }
0x1099   :  { %v1174_v44 = vpop.xlane.xlu1 %1173 }
0x109a   :  { %2253 = vrcp.f32 %v1174_v44  ;;  %v2199_v44 = vld [vmem:[%s2929_s19] sm:$0xff]  }
0x109b   :  { %2255 = vrcp.f32 %v1171_v45  ;;  %v2200_v45 = vld [vmem:[%s2929_s19 + $0x8] sm:$0xff]  }
0x10a4   :  { %v2254_v25 = vpop.eup %2253 }
0x10a5   :  { %v2256_v53 = vpop.eup %2255  ;;  %v1178_v55 = vmul.f32 %v2254_v25, %v2248_v32  ;;  %v2190_v32 = vld [vmem:[%s2928_s18 + $0x10] ss:$8 sps:$4 sm:$0xff]  }
0x10a6   :  { %v1177_v57 = vmul.f32 %v2256_v53, %v2246_v30  ;;  %v2189_v30 = vld [vmem:[%s2928_s18 + $0x4] ss:$8 sps:$4 sm:$0xff]   ;;  %v2201_v25 = vld [vmem:[%s2929_s19 + $0x10] sm:$0xff]  }
0x10a7   :  { %v2204_v53 = vld [vmem:[%s2929_s19 + $0x28] sm:$0xff]  }
0x10a8   :  { %v1179_v59 = vpack.c.bf16 %v1178_v55, %v1177_v57  ;;  %v2206_v55 = vld [vmem:[%s2929_s19 + $0x38] sm:$0xff]  }
0x1102   :  { %v1303_v46 = vpop.xlane.xlu0 %1302 }
0x1103   :  { %2257 = vrcp.f32 %v1303_v46  ;;  %v2203_v46 = vld [vmem:[%s2929_s19 + $0x20] sm:$0xff]  }
0x1104   :  { %v1306_v54 = vpop.xlane.xlu1 %1305 }
0x1105   :  { %2259 = vrcp.f32 %v1306_v54  ;;  %v2205_v54 = vld [vmem:[%s2929_s19 + $0x30] sm:$0xff]  }
0x1106   :  { %v1182_v56 = vpop.permute.xlu0 %1181 }
0x1107   :  { %v1187_v58 = vsel %vm498_vm10, %v1182_v56, 0 }
0x1108   :  { %v1313_v47 = vpop.permute.xlu1 %1312  ;;  %2057 = vmatpush3.bf16.msra.mxu1 %v1187_v58 }
0x1109   :  { %2068 = vmatprep.subr.bf16.mxu1 %v2296_v49  ;;  %v1318_v60 = vsel %vm498_vm10, %v1313_v47, 0 }
0x110b   :  { %2059 = vmatmul.mubr.msk.bf16.vlgmr.msra.gmra.mrb[32].mxu1 %vm468_vm8, %v1179_v59 }
0x110c   :  { %2069 = vmatpush3.bf16.msra.mxu1 %v1318_v60  ;;  %2070 = vmatprep.mubr.msk.bf16.mxu1 %vm2297_vm5, %v2296_v49 }
0x110d   :  { %v2258_v61 = vpop.eup %2257  ;;  %1515 = vmatprep.subr.bf16.mxu1 %v2189_v30 }
0x110e   :  { %v1309_v50 = vmul.f32 %v2258_v61, %v2250_v39 }
0x110f   :  { %v2260_v62 = vpop.eup %2259 }
0x1110   :  { %v1310_v63 = vmul.f32 %v2260_v62, %v2252_v41 }
0x1112   :  { %v1311_v0 = vpack.c.bf16 %v1310_v63, %v1309_v50 }
0x1114   :  { %2071 = vmatmul.mubr.msk.bf16.vlgmr.msra.gmra.mrb[36].mxu1 %vm468_vm8, %v1311_v0 }
0x1115   :  { %1547 = vmatprep.mubr.bf16.mxu1 %v2293_v1  ;;  %1516 = vmatpush1.bf16.msra.mxu1 %v2187_v31 }
0x11de   :  { %v1223_v48 = vpop.f32.mrb[32].mxu1 }
0x11df   :  { %v2060_v52 = vpop.f32.mrb[33].mxu1 }
0x11e0   :  { %v1226_v2 = vpop.f32.mrb[34].mxu1 }
0x11e1   :  { %1231 = vrot.lane.b32.xlu0 %v1226_v2, %s2302_s25  ;;  %v2061_v4 = vpop.f32.mrb[35].mxu1 }
0x11e7   :  { %v1354_v7 = vpop.f32.mrb[36].mxu1 }
0x11e8   :  { %v2072_v8 = vpop.f32.mrb[37].mxu1 }
0x11e9   :  { %v1357_v10 = vpop.f32.mrb[38].mxu1  ;;  %v2212_v8 = vld [vmem:[%s2916_s6 + $0x14] ss:$8 sps:$4 sm:$0xff]  }
0x11ea   :  { %1362 = vrot.lane.b32.xlu1 %v1357_v10, %s2302_s25  ;;  %v2073_v12 = vpop.f32.mrb[39].mxu1  ;;  %v2210_v10 = vld [vmem:[%s2916_s6 + $0x10] ss:$8 sps:$4 sm:$0xff]  }
0x11eb   :  { %v2213_v12 = vld [vmem:[%s2916_s6 + $0x20] ss:$8 sps:$4 sm:$0xff]  }
0x1253   :  { %v1232_v16 = vpop.permute.xlu0 %1231 }
0x1254   :  { %v1234_v17 = vsel %vm418_vm6, %v1223_v48, %v1232_v16 }
0x125c   :  { %v1363_v14 = vpop.permute.xlu1 %1362 }
0x125d   :  { %v1365_v15 = vsel %vm418_vm6, %v1354_v7, %v1363_v14  ;;  %v2207_v7 = vld [vmem:[%s2916_s6] ss:$8 sps:$4 sm:$0xff]   ;;  %v2218_v14 = vld [vmem:[%s2916_s6 + $0x34] ss:$8 sps:$4 sm:$0xff]  }
0x125e   :  { %1367 = vrot.lane.b32.xlu1 %v1365_v15, %s2300_s2  ;;  %v2216_v15 = vld [vmem:[%s2916_s6 + $0x30] ss:$8 sps:$4 sm:$0xff]   ;;  %s2304_s6 = smov [#allocation2]  }
0x125f   :  { %s1812_s5 = sshll.u32 %s2304_s6, 4  ;;  %s1813_s5 = int_to_ptr.vmem [resolvable:$true] %s1812_s5 }
0x1260   :  { %p2274_p1 = scmp.lt.s32.totalorder %s1813_s5, %s1813_s5 }
0x12d0   :  { %v1368_v20 = vpop.permute.xlu1 %1367 }
0x12d1   :  { %v1370_v19 = vsel %vm683_vm11, %v1234_v17, %v1368_v20 }
0x12d2   :  { %v1371_v21 = vpack.c.bf16 %v1370_v19, %v1370_v19 }
0x12d4   :  { %2083 = vmatmul.mubr.msk.bf16.vlgmr.msra.gmra.mrb[16].mxu0 %vm285_vm4, %v1371_v21  ;;  %v1918_v21 = vld [vmem:[%s2917_s7] ss:$0 sm:$0xff]  ;;  %s2269_s7 = scalar_lea.vmem %s1813_s5, 32 }
0x12d5   :  { %2102 = vmatprep.mubr.msk.bf16.mxu0 %vm2297_vm5, %v2296_v49  ;;  %2087 = vmatpush3.bf16.msra.mxu0 %v2199_v44  ;;  %p2270_p0 = scmp.ne.s32.totalorder %s1813_s5, %s2269_s7  ;;  %p2275_p2 = scmp.lt.s32.totalorder %s2269_s7, %s2269_s7 }
0x12d6   :  { %2088 = vmatprep.subr.bf16.mxu0 %v2296_v49 }
0x12d7   :  { %p2276_p3 = por %p2275_p2, %p2274_p1 }
0x12d9   :  { %2089 = vmatpush3.bf16.msra.mxu0 %v2200_v45  ;;  %p2277_p4 = pnand %p2276_p3, %p2270_p0 }
0x12da   :  { %2090 = vmatprep.subr.bf16.mxu0 %v2296_v49 }
0x12dd   :  { %2091 = vmatpush3.bf16.msra.mxu0 %v2201_v25 }
0x12de   :  { %2092 = vmatprep.subr.bf16.mxu0 %v2296_v49 }
0x13a7   :  { %v1441_v22 = vpop.f32.mrb[16].mxu0 }
0x13a8   :  { %v2801_v23 = vadd.f32 %v1441_v22, %v2688_v26  ;;  %v2084_v24 = vpop.f32.mrb[17].mxu0  ;;  %v2192_v26 = vld [vmem:[%s2928_s18 + $0x14] ss:$8 sps:$4 sm:$0xff]  }
0x13a9   :  { %v1444_v27 = vpop.f32.mrb[18].mxu0  ;;  %1517 = vmatprep.subr.bf16.mxu1 %v2192_v26 }
0x13aa   :  { %v2085_v28 = vpop.f32.mrb[19].mxu0  ;;  %v1448_v29 = vmul.f32 %v2801_v23, %v2801_v23  ;;  %1518 = vmatpush1.bf16.msra.mxu1 %v2190_v32 }
0x13ab   :  { %1519 = vmatprep.subr.bf16.mxu1 %v2195_v11 }
0x13ac   :  { %v1449_v9 = vsel %vm285_vm4, %v1448_v29, 0.0  ;;  %v2303_v29 = vmov 1966171168  }
0x13ad   :  { %1450 = vadd.xlane.f32.xlu0 %v1449_v9  ;;  %v1787_v9 = vunpack.c.l.s4 %v2303_v29 }
0x13ae   :  { %1520 = vmatpush1.bf16.msra.mxu1 %v2193_v33 }
0x13af   :  { %1521 = vmatprep.subr.bf16.mxu1 %v2198_v35  ;;  %v1788_v30 = vunpack.c.0.s8 %v1787_v9 }
0x13b1   :  { %v1791_v26 = vsub.s32 %v1788_v30, %v2542_v5 }
0x13b2   :  { %1522 = vmatpush1.bf16.msra.mxu1 %v2196_v34 }
0x13b3   :  { %1742 = vmatprep.subr.bf16.mxu1 %v2209_v6 }
0x143a   :  { %v1451_v36 = vpop.xlane.xlu0 %1450 }
0x143b   :  { %v1452_v37 = vmul.f32 0.015625, %v1451_v36 }
0x143d   :  { %v1453_v38 = vadd.f32 1e-06, %v1452_v37 }
0x143f   :  { %2261 = vrsqrt.f32 %v1453_v38 }
0x1449   :  { %v2262_v39 = vpop.eup %2261 }
0x144a   :  { %v1455_v41 = vmul.f32 %v2262_v39, %v2801_v23 }
0x144c   :  { %v1462_v42 = vmul.f32 %v1899_v40, %v1455_v41 }
0x144e   :  { %v1463_v43 = vpack.c.bf16 %v1462_v42, %v1462_v42 }
0x1450   :  { %1908 = vmatmul.mubr.msk.bf16.vlgmr.msra.gmra.mrb[40].mxu1 %vm285_vm4, %v1463_v43 }
0x1451   :  { %1774 = vmatprep.mubr.bf16.mxu1 %v2293_v1  ;;  %v2202_v1 = vld [vmem:[%s2929_s19 + $0x18] sm:$0xff]   ;;  %1743 = vmatpush1.bf16.msra.mxu1 %v2207_v7 }
0x1452   :  { %2093 = vmatpush3.bf16.msra.mxu0 %v2202_v1  ;;  %1744 = vmatprep.subr.bf16.mxu1 %v2212_v8 }
0x1453   :  { %2094 = vmatprep.subr.bf16.mxu0 %v2296_v49 }
0x1455   :  { %1745 = vmatpush1.bf16.msra.mxu1 %v2210_v10 }
0x1456   :  { %2095 = vmatpush3.bf16.msra.mxu0 %v2203_v46  ;;  %1746 = vmatprep.subr.bf16.mxu1 %v2215_v13 }
0x1457   :  { %2096 = vmatprep.subr.bf16.mxu0 %v2296_v49 }
0x1459   :  { %1747 = vmatpush1.bf16.msra.mxu1 %v2213_v12 }
0x145a   :  { %2097 = vmatpush3.bf16.msra.mxu0 %v2204_v53  ;;  %1748 = vmatprep.subr.bf16.mxu1 %v2218_v14 }
0x145b   :  { %2098 = vmatprep.subr.bf16.mxu0 %v2296_v49 }
0x145d   :  { %1749 = vmatpush1.bf16.msra.mxu1 %v2216_v15 }
0x145e   :  { %2099 = vmatpush3.bf16.msra.mxu0 %v2205_v54 }
0x145f   :  { %2100 = vmatprep.subr.bf16.mxu0 %v2296_v49 }
0x1462   :  { %2101 = vmatpush3.bf16.msra.mxu0 %v2206_v55 }
0x1523   :  { %v1549_v56 = vpop.f32.mrb[40].mxu1 }
0x1524   :  { %v1909_v57 = vmul.f32 -1.442695, %v1549_v56  ;;  %v1551_v58 = vpop.f32.mrb[41].mxu1 }
0x1525   :  { %v1553_v47 = vpop.f32.mrb[42].mxu1 }
0x1526   :  { %2263 = vpow2.f32 %v1909_v57  ;;  %v1554_v59 = vpop.f32.mrb[43].mxu1 }
0x1530   :  { %v2264_v60 = vpop.eup %2263 }
0x1531   :  { %v1559_v61 = vadd.f32 1.0, %v2264_v60 }
0x1533   :  { %2265 = vrcp.f32 %v1559_v61 }
0x153d   :  { %v2266_v62 = vpop.eup %2265 }
0x153e   :  { %v1562_v50 = vmul.f32 %v2266_v62, %v1549_v56 }
0x1540   :  { %v1563_v63 = vmul.f32 %v1562_v50, %v1551_v58 }
0x1542   :  { %v1564_v0 = vpack.c.bf16 %v1563_v63, %v1563_v63 }
0x1544   :  { %2103 = vmatmul.mubr.bf16.vlgmr.msra.gmra.mrb[20].mxu0 %v1564_v0 }
0x1617   :  { %v1663_v49 = vpop.f32.mrb[20].mxu0 }
0x1618   :  { %v1664_v48 = vadd.f32 %v1663_v49, %v2801_v23  ;;  %v2104_v51 = vpop.f32.mrb[21].mxu0 }
0x1619   :  { %v1666_v52 = vpop.f32.mrb[22].mxu0 }
0x161a   :  { %v2105_v2 = vpop.f32.mrb[23].mxu0  ;;  %v1670_v3 = vmul.f32 %v1664_v48, %v1664_v48 }
0x161c   :  { %v1672_v4 = vsel %vm1671_vm12, %v1670_v3, 0.0 }
0x161d   :  { %1673 = vadd.xlane.f32.xlu1 %v1672_v4 }
0x16aa   :  { %v1674_v16 = vpop.xlane.xlu1 %1673 }
0x16ab   :  { %v1675_v17 = vmul.f32 0.015625, %v1674_v16 }
0x16ad   :  { %v1676_v20 = vadd.f32 1e-06, %v1675_v17 }
0x16af   :  { %2267 = vrsqrt.f32 %v1676_v20 }
0x16b9   :  { %v2268_v19 = vpop.eup %2267 }
0x16ba   :  { %v1678_v22 = vmul.f32 %v2268_v19, %v1664_v48 }
0x16bc   :  { %v1685_v23 = vmul.f32 %v1918_v21, %v1678_v22 }
0x16be   :  { %v1686_v24 = vpack.c.bf16 %v1685_v23, %v1685_v23 }
0x16c0   :  { %v1696_v27 = vshrl.u32 %v1686_v24, 16 }
0x16c2   :  { %v1698_v28 = vrot.slane %v1696_v27, 3 }
0x16c4   :  { %1927 = vmatmul.mubr.msk.bf16.vlgmr.msra.gmra.mrb[44].mxu1 %vm285_vm4, %v1698_v28 }
0x1797   :  { %v1776_v31 = vpop.f32.mrb[44].mxu1 }
0x1798   :  { %v1778_v32 = vpop.f32.mrb[45].mxu1 }
0x1799   :  { %v1785_v11 = vcombine.low %v1776_v31, %v1778_v32  ;;  %v1780_v33 = vpop.f32.mrb[46].mxu1 }
0x179a   :  { %v1781_v34 = vpop.f32.mrb[47].mxu1 }
0x179b   :  { %v1792_v35 = vrot.slane %v1785_v11, %v1791_v26 }
0x179d   :  { %v1799_v36 = vrot.slane %v1792_v35, %v1791_v26 }
0x179f   :  { %1805 = vst.msk [vmem:[#allocation2] sm:$0x3] %vm1803_vm13, %v1799_v36 }
0x17a0   :  { %2280 = shalt.err (!%p2277_p4)
}
0x17a1   :  { %s2281_s17 = scalar_lea.hbm %s2930_s20, 32 }
0x17a2   :  { %p2282_p5 = scmp.ne.s32.totalorder %s2930_s20, %s2281_s17  ;;  %p2285_p6 = scmp.lt.u32.totalorder %s2281_s17, %s2930_s20 }
0x17a4   :  { %p2287_p7 = pnand %p2285_p6, %p2282_p5 }
0x17a6   :  { %2290 = shalt.err (!%p2287_p7)
}
0x17a7   :  { %1815 = dma.vmem_to_hbm [thread:$0]  %s1813_s5, 32, %s2930_s20, [#allocation3]  }
0x17a8   :  { %2291 = dma.done.wait [#allocation3], 32  }
0x17a9   :  { %2292 = vsyncadd [#allocation3], 4294967264 }
0x17aa   :  { %1819 = vsyncpa [#allocation3], 1 }

</bundles_post_ra>
